<compile_context>
chip_gen: v7x
topology: tpu7x:2x2x1
jax: 0.10.0
libtpu: 0.0.40
codegen_flags: <defaults>
</compile_context>

<pallas_src>
import functools

import jax
import jax.numpy as jnp
from jax.experimental import pallas as pl
from jax.experimental.pallas import tpu as pltpu


# ---------------------------------------------------------------------------
# Helpers
# ---------------------------------------------------------------------------
def _round_up(x, m):
    return ((x + m - 1) // m) * m


def _layernorm(v, gamma, beta, eps=1e-6):
    # The PyTorch module uses nn.LayerNorm(..., eps=1e-06) explicitly, so 1e-6
    # (not the nn.LayerNorm default of 1e-5) is the correct parity value.
    mu = jnp.mean(v, axis=-1, keepdims=True)
    var = jnp.mean((v - mu) ** 2, axis=-1, keepdims=True)
    return (v - mu) * jax.lax.rsqrt(var + eps) * gamma + beta


# Vector-slab row order per block (9 rows):
#   0:g1 1:be1 2:b1 3:g2 4:be2 5:b2 6:bs 7:g3 8:be3
_VEC_ROWS = 9
_W_MATS = 3  # w1, w2, ws


def _pack_params(block_params, d_max):
    """Pack all tiny per-block params into two slabs.

    vec_slab: (9*n, d_max) f32  -- gammas / betas / biases (zero padded).
    w_slab:   (3*n, d_max, d_max) bf16 -- w1, w2, ws (zero padded).
    """
    vec_rows = []
    w_blocks = []

    def padv(v):
        out = jnp.zeros((1, d_max), jnp.float32)
        return out.at[:, : v.shape[-1]].set(v.reshape(1, -1).astype(jnp.float32))

    def padw(w):
        out = jnp.zeros((d_max, d_max), jnp.float32)
        return out.at[: w.shape[0], : w.shape[1]].set(w.astype(jnp.float32))

    for p in block_params:
        vec_rows += [
            padv(p["g1"]), padv(p["be1"]), padv(p["b1"]),
            padv(p["g2"]), padv(p["be2"]), padv(p["b2"]),
            padv(p["bs"]), padv(p["g3"]), padv(p["be3"]),
        ]
        w_blocks += [padw(p["w1"]), padw(p["w2"]), padw(p["ws"])]

    vec_slab = jnp.concatenate(vec_rows, axis=0)                 # (9n, d_max) f32
    w_slab = jnp.stack(w_blocks, axis=0).astype(jnp.bfloat16)    # (3n, d, d) bf16
    return vec_slab, w_slab


# ---------------------------------------------------------------------------
# Fused Pallas kernel: all GCN_ResBlocks of one GraphLayer in one body.
# Grid is 1-D over row tiles; the activation tile never leaves VMEM between
# blocks. TODO(synk): nn.Dropout(p=0.01) is identity in eval mode; omitted.
# ---------------------------------------------------------------------------
def graph_layer_kernel(x_ref, vec_ref, w_ref, o_ref, *, dims):
    n = len(dims)
    x = x_ref[...].astype(jnp.float32)
    vecs = vec_ref[...]  # (9n, d_max) f32, tiny; one load per grid step

    for b, (din, dmid, dout) in enumerate(dims):  # static unroll
        r = _VEC_ROWS * b
        g1 = vecs[r + 0:r + 1, :din]
        be1 = vecs[r + 1:r + 2, :din]
        b1 = vecs[r + 2:r + 3, :dmid]
        g2 = vecs[r + 3:r + 4, :dmid]
        be2 = vecs[r + 4:r + 5, :dmid]
        b2 = vecs[r + 5:r + 6, :dout]
        bs = vecs[r + 6:r + 7, :dout]
        g3 = vecs[r + 7:r + 8, :dout]
        be3 = vecs[r + 8:r + 9, :dout]

        w1 = w_ref[_W_MATS * b + 0][:din, :dmid]   # bf16
        w2 = w_ref[_W_MATS * b + 1][:dmid, :dout]  # bf16
        ws = w_ref[_W_MATS * b + 2][:din, :dout]   # bf16

        # fc1 path and shortcut as two separate bf16 dots (f32 accumulate);
        # the MXU has slack and this avoids the old concat/slice VMEM copies.
        x_bf = x.astype(jnp.bfloat16)
        h = jnp.maximum(_layernorm(x, g1, be1), 0.0).astype(jnp.bfloat16)
        x1 = jnp.dot(h, w1, preferred_element_type=jnp.float32) + b1
        x1 = jnp.maximum(_layernorm(x1, g2, be2), 0.0).astype(jnp.bfloat16)
        x1 = jnp.dot(x1, w2, preferred_element_type=jnp.float32) + b2
        x2 = jnp.dot(x_bf, ws, preferred_element_type=jnp.float32) + bs

        x = _layernorm(x1 + x2, g3, be3)
        if b != n - 1:  # trailing ReLU between blocks (GraphLayer)
            x = jnp.maximum(x, 0.0)

    o_ref[...] = x.astype(o_ref.dtype)


def graph_layer_forward(verts_f, block_params, tile_rows=1024):
    """verts_f: (B, V, in_dim) float32. Returns (B, V, out_dim)."""
    B, V, in_dim = verts_f.shape
    dims = tuple(
        (p["w1"].shape[0], p["w1"].shape[1], p["w2"].shape[1])
        for p in block_params
    )
    out_dim = dims[-1][2]
    d_max = max(max(d) for d in dims)

    R = B * V
    x = verts_f.reshape(R, in_dim).astype(jnp.float32)

    # Row tile: big to amortize the ~0.35 us/step pipeline overhead, but
    # capped so the "parallel" grid has >= 2 steps whenever possible (v7x
    # megacore can only shard a multi-step grid).  Rows are zero-padded
    # (LayerNorm-safe) so any (B, V) works, then the pad is sliced off.
    R8 = _round_up(R, 8)
    tr = max(8, (int(tile_rows) // 8) * 8)
    if R8 >= 16:
        tr = min(tr, max(8, ((R8 // 2) // 8) * 8))
    else:
        tr = R8
    R_pad = _round_up(R, tr)
    if R_pad != R:
        x = jnp.concatenate(
            [x, jnp.zeros((R_pad - R, in_dim), x.dtype)], axis=0
        )

    vec_slab, w_slab = _pack_params(block_params, d_max)

    kernel = functools.partial(graph_layer_kernel, dims=dims)

    out = pl.pallas_call(
        kernel,
        out_shape=jax.ShapeDtypeStruct((R_pad, out_dim), jnp.float32),
        grid_spec=pltpu.PrefetchScalarGridSpec(
            num_scalar_prefetch=0,
            grid=(R_pad // tr,),
            in_specs=[
                pl.BlockSpec((tr, in_dim), lambda i: (i, 0)),
                # Constant index_map -> DMA'd once, kept resident in VMEM.
                pl.BlockSpec(vec_slab.shape, lambda i: (0, 0)),
                pl.BlockSpec(w_slab.shape, lambda i: (0, 0, 0)),
            ],
            out_specs=pl.BlockSpec((tr, out_dim), lambda i: (i, 0)),
        ),
        compiler_params=pltpu.CompilerParams(
            dimension_semantics=("parallel",),   # shard row tiles across TCs
            vmem_limit_bytes=32 * 1024 * 1024,   # right-sized; real need ~MiB
        ),
    )(x, vec_slab, w_slab)

    return out[:R].reshape(B, V, out_dim)


# ---------------------------------------------------------------------------
# Parameter init (mirrors weights_init: xavier_uniform Linear weights, zero
# Linear biases, default LayerNorm gamma=1 / beta=0)
# ---------------------------------------------------------------------------
def xavier_uniform(key, fan_in, fan_out):
    bound = jnp.sqrt(6.0 / (fan_in + fan_out))
    # Stored transposed vs. PyTorch nn.Linear weight: (in, out) so the kernel
    # computes x @ W without a transpose.
    return jax.random.uniform(
        key, (fan_in, fan_out), jnp.float32, minval=-bound, maxval=bound
    )


def init_block_params(key, in_dim, out_dim, mid_dim):
    k1, k2, k3 = jax.random.split(key, 3)
    return {
        "g1": jnp.ones((1, in_dim), jnp.float32),
        "be1": jnp.zeros((1, in_dim), jnp.float32),
        "w1": xavier_uniform(k1, in_dim, mid_dim),
        "b1": jnp.zeros((1, mid_dim), jnp.float32),
        "g2": jnp.ones((1, mid_dim), jnp.float32),
        "be2": jnp.zeros((1, mid_dim), jnp.float32),
        "w2": xavier_uniform(k2, mid_dim, out_dim),
        "b2": jnp.zeros((1, out_dim), jnp.float32),
        "ws": xavier_uniform(k3, in_dim, out_dim),
        "bs": jnp.zeros((1, out_dim), jnp.float32),
        "g3": jnp.ones((1, out_dim), jnp.float32),
        "be3": jnp.zeros((1, out_dim), jnp.float32),
    }


def init_graph_layer(key, in_dim, out_dim, graph_layer_num):
    keys = jax.random.split(key, graph_layer_num)
    params = [init_block_params(keys[0], in_dim, out_dim, out_dim)]
    for i in range(1, graph_layer_num):
        params.append(init_block_params(keys[i], out_dim, out_dim, out_dim))
    return params


# ---------------------------------------------------------------------------
# Pure-JAX reference for correctness checking (f32 weights)
# ---------------------------------------------------------------------------
def ref_block(x, p, apply_out_relu):
    def ln(v, g, b):
        mu = jnp.mean(v, axis=-1, keepdims=True)
        var = jnp.mean((v - mu) ** 2, axis=-1, keepdims=True)
        return (v - mu) / jnp.sqrt(var + 1e-6) * g + b

    x1 = jnp.maximum(ln(x, p["g1"], p["be1"]), 0.0) @ p["w1"] + p["b1"]
    x1 = jnp.maximum(ln(x1, p["g2"], p["be2"]), 0.0) @ p["w2"] + p["b2"]
    x2 = x @ p["ws"] + p["bs"]
    out = ln(x1 + x2, p["g3"], p["be3"])
    return jnp.maximum(out, 0.0) if apply_out_relu else out


def ref_forward(verts_f, block_params):
    B, V, D = verts_f.shape
    x = verts_f.reshape(B * V, D)
    n = len(block_params)
    for i, p in enumerate(block_params):
        x = ref_block(x, p, i != n - 1)
    return x.reshape(B, V, -1)


if __name__ == "__main__":
    key = jax.random.PRNGKey(0)
    k_x, k_p, k_x2, k_p2 = jax.random.split(key, 4)

    # Case 1: first block changes dims (64 -> 32), 3 fused blocks; R=32 rows
    # -> 2-step grid (exercises the >=2-step cap for megacore sharding).
    B, V, in_dim, out_dim, nblk = 2, 16, 64, 32, 3
    verts_f = jax.random.normal(k_x, (B, V, in_dim), jnp.float32)
    params = init_graph_layer(k_p, in_dim, out_dim, nblk)

    out = jax.block_until_ready(graph_layer_forward(verts_f, params))
    ref = ref_forward(verts_f, params)
    assert out.shape == (B, V, out_dim)
    # Tolerance relaxed vs. pure-f32 because matmul operands are bf16.
    assert jnp.allclose(out, ref, atol=3e-2, rtol=3e-2), \
        "mismatch vs reference (case 1)"

    # Case 2: row count (20) not a multiple of the tile -> exercises the
    # zero-pad tail and a multi-step grid.
    B2, V2, d2 = 1, 20, 32
    verts_f2 = jax.random.normal(k_x2, (B2, V2, d2), jnp.float32)
    params2 = init_graph_layer(k_p2, d2, d2, 2)

    out2 = jax.block_until_ready(
        graph_layer_forward(verts_f2, params2, tile_rows=16)
    )
    ref2 = ref_forward(verts_f2, params2)
    assert out2.shape == (B2, V2, d2)
    assert jnp.allclose(out2, ref2, atol=3e-2, rtol=3e-2), \
        "mismatch vs reference (case 2)"

    print("KERNEL_OK")
</pallas_src>

<mosaic_0001>
module attributes {stable_mosaic.version = 11 : i64} {
  func.func @graph_layer_kernel(%arg0: i32, %arg1: memref<16x64xf32, #tpu.memory_space<vmem>>, %arg2: memref<27x64xf32, #tpu.memory_space<vmem>>, %arg3: memref<9x64x64xbf16, #tpu.memory_space<vmem>>, %arg4: memref<16x32xf32, #tpu.memory_space<vmem>>) attributes {dimension_semantics = [#tpu.dimension_semantics<parallel>], iteration_bounds = array<i64: 2>, scalar_prefetch = 0 : i64, scratch_operands = 0 : i64, tpu.core_type = #tpu.core_type<tc>, window_params = [{transform_indices = @transform_0, window_bounds = array<i64: 16, 64>}, {pipeline_mode = #tpu.pipeline_mode<synchronous>, transform_indices = @transform_1, window_bounds = array<i64: 27, 64>}, {pipeline_mode = #tpu.pipeline_mode<synchronous>, transform_indices = @transform_2, window_bounds = array<i64: 9, 64, 64>}, {transform_indices = @transform_3, window_bounds = array<i64: 16, 32>}]} {
    %c0 = arith.constant 0 : index
    %c0_0 = arith.constant 0 : index
    %0 = vector.load %arg1[%c0, %c0_0] : memref<16x64xf32, #tpu.memory_space<vmem>>, vector<16x64xf32>
    %c0_1 = arith.constant 0 : index
    %c0_2 = arith.constant 0 : index
    %1 = vector.load %arg2[%c0_1, %c0_2] : memref<27x64xf32, #tpu.memory_space<vmem>>, vector<27x64xf32>
    %2 = vector.extract_strided_slice %1 {offsets = [0, 0], sizes = [1, 64], strides = [1, 1]} : vector<27x64xf32> to vector<1x64xf32>
    %3 = vector.extract_strided_slice %1 {offsets = [1, 0], sizes = [1, 64], strides = [1, 1]} : vector<27x64xf32> to vector<1x64xf32>
    %4 = vector.extract_strided_slice %1 {offsets = [2, 0], sizes = [1, 32], strides = [1, 1]} : vector<27x64xf32> to vector<1x32xf32>
    %5 = vector.extract_strided_slice %1 {offsets = [3, 0], sizes = [1, 32], strides = [1, 1]} : vector<27x64xf32> to vector<1x32xf32>
    %6 = vector.extract_strided_slice %1 {offsets = [4, 0], sizes = [1, 32], strides = [1, 1]} : vector<27x64xf32> to vector<1x32xf32>
    %7 = vector.extract_strided_slice %1 {offsets = [5, 0], sizes = [1, 32], strides = [1, 1]} : vector<27x64xf32> to vector<1x32xf32>
    %8 = vector.extract_strided_slice %1 {offsets = [6, 0], sizes = [1, 32], strides = [1, 1]} : vector<27x64xf32> to vector<1x32xf32>
    %9 = vector.extract_strided_slice %1 {offsets = [7, 0], sizes = [1, 32], strides = [1, 1]} : vector<27x64xf32> to vector<1x32xf32>
    %10 = vector.extract_strided_slice %1 {offsets = [8, 0], sizes = [1, 32], strides = [1, 1]} : vector<27x64xf32> to vector<1x32xf32>
    %c0_3 = arith.constant 0 : index
    %c0_4 = arith.constant 0 : index
    %c0_5 = arith.constant 0 : index
    %11 = vector.load %arg3[%c0_3, %c0_4, %c0_5] : memref<9x64x64xbf16, #tpu.memory_space<vmem>>, vector<1x64x64xbf16>
    %12 = vector.shape_cast %11 : vector<1x64x64xbf16> to vector<64x64xbf16>
    %13 = vector.extract_strided_slice %12 {offsets = [0, 0], sizes = [64, 32], strides = [1, 1]} : vector<64x64xbf16> to vector<64x32xbf16>
    %c1 = arith.constant 1 : index
    %c0_6 = arith.constant 0 : index
    %c0_7 = arith.constant 0 : index
    %14 = vector.load %arg3[%c1, %c0_6, %c0_7] : memref<9x64x64xbf16, #tpu.memory_space<vmem>>, vector<1x64x64xbf16>
    %15 = vector.shape_cast %14 : vector<1x64x64xbf16> to vector<64x64xbf16>
    %16 = vector.extract_strided_slice %15 {offsets = [0, 0], sizes = [32, 32], strides = [1, 1]} : vector<64x64xbf16> to vector<32x32xbf16>
    %c2 = arith.constant 2 : index
    %c0_8 = arith.constant 0 : index
    %c0_9 = arith.constant 0 : index
    %17 = vector.load %arg3[%c2, %c0_8, %c0_9] : memref<9x64x64xbf16, #tpu.memory_space<vmem>>, vector<1x64x64xbf16>
    %18 = vector.shape_cast %17 : vector<1x64x64xbf16> to vector<64x64xbf16>
    %19 = vector.extract_strided_slice %18 {offsets = [0, 0], sizes = [64, 32], strides = [1, 1]} : vector<64x64xbf16> to vector<64x32xbf16>
    %20 = arith.truncf %0 : vector<16x64xf32> to vector<16x64xbf16>
    %cst = arith.constant dense<0.000000e+00> : vector<16xf32>
    %21 = vector.multi_reduction <add>, %0, %cst [1] : vector<16x64xf32> to vector<16xf32>
    %22 = vector.shape_cast %21 : vector<16xf32> to vector<16x1xf32>
    %cst_10 = arith.constant 6.400000e+01 : f32
    %23 = vector.broadcast %cst_10 : f32 to vector<16x1xf32>
    %24 = arith.divf %22, %23 : vector<16x1xf32>
    %25 = vector.broadcast %24 : vector<16x1xf32> to vector<16x64xf32>
    %26 = arith.subf %0, %25 : vector<16x64xf32>
    %27 = arith.mulf %26, %26 : vector<16x64xf32>
    %cst_11 = arith.constant dense<0.000000e+00> : vector<16xf32>
    %28 = vector.multi_reduction <add>, %27, %cst_11 [1] : vector<16x64xf32> to vector<16xf32>
    %29 = vector.shape_cast %28 : vector<16xf32> to vector<16x1xf32>
    %cst_12 = arith.constant 6.400000e+01 : f32
    %30 = vector.broadcast %cst_12 : f32 to vector<16x1xf32>
    %31 = arith.divf %29, %30 : vector<16x1xf32>
    %32 = vector.broadcast %24 : vector<16x1xf32> to vector<16x64xf32>
    %33 = arith.subf %0, %32 : vector<16x64xf32>
    %cst_13 = arith.constant 9.99999997E-7 : f32
    %34 = vector.broadcast %cst_13 : f32 to vector<16x1xf32>
    %35 = arith.addf %31, %34 : vector<16x1xf32>
    %36 = math.rsqrt %35 : vector<16x1xf32>
    %37 = vector.broadcast %36 : vector<16x1xf32> to vector<16x64xf32>
    %38 = arith.mulf %33, %37 : vector<16x64xf32>
    %39 = vector.broadcast %2 : vector<1x64xf32> to vector<16x64xf32>
    %40 = arith.mulf %38, %39 : vector<16x64xf32>
    %41 = vector.broadcast %3 : vector<1x64xf32> to vector<16x64xf32>
    %42 = arith.addf %40, %41 : vector<16x64xf32>
    %cst_14 = arith.constant 0.000000e+00 : f32
    %43 = vector.broadcast %cst_14 : f32 to vector<16x64xf32>
    %44 = arith.maximumf %42, %43 : vector<16x64xf32>
    %45 = arith.truncf %44 : vector<16x64xf32> to vector<16x64xbf16>
    %cst_15 = arith.constant dense<0.000000e+00> : vector<16x32xf32>
    %46 = tpu.matmul %45, %13, %cst_15 {dimension_numbers = #tpu.dot_dimension_numbers<[1], [0], [0], [1], [0, 0, 1, 1], [], []>} : vector<16x64xbf16>, vector<64x32xbf16>, vector<16x32xf32> -> vector<16x32xf32>
    %47 = vector.broadcast %4 : vector<1x32xf32> to vector<16x32xf32>
    %48 = arith.addf %46, %47 : vector<16x32xf32>
    %cst_16 = arith.constant dense<0.000000e+00> : vector<16xf32>
    %49 = vector.multi_reduction <add>, %48, %cst_16 [1] : vector<16x32xf32> to vector<16xf32>
    %50 = vector.shape_cast %49 : vector<16xf32> to vector<16x1xf32>
    %cst_17 = arith.constant 3.200000e+01 : f32
    %51 = vector.broadcast %cst_17 : f32 to vector<16x1xf32>
    %52 = arith.divf %50, %51 : vector<16x1xf32>
    %53 = vector.broadcast %52 : vector<16x1xf32> to vector<16x32xf32>
    %54 = arith.subf %48, %53 : vector<16x32xf32>
    %55 = arith.mulf %54, %54 : vector<16x32xf32>
    %cst_18 = arith.constant dense<0.000000e+00> : vector<16xf32>
    %56 = vector.multi_reduction <add>, %55, %cst_18 [1] : vector<16x32xf32> to vector<16xf32>
    %57 = vector.shape_cast %56 : vector<16xf32> to vector<16x1xf32>
    %cst_19 = arith.constant 3.200000e+01 : f32
    %58 = vector.broadcast %cst_19 : f32 to vector<16x1xf32>
    %59 = arith.divf %57, %58 : vector<16x1xf32>
    %60 = vector.broadcast %52 : vector<16x1xf32> to vector<16x32xf32>
    %61 = arith.subf %48, %60 : vector<16x32xf32>
    %cst_20 = arith.constant 9.99999997E-7 : f32
    %62 = vector.broadcast %cst_20 : f32 to vector<16x1xf32>
    %63 = arith.addf %59, %62 : vector<16x1xf32>
    %64 = math.rsqrt %63 : vector<16x1xf32>
    %65 = vector.broadcast %64 : vector<16x1xf32> to vector<16x32xf32>
    %66 = arith.mulf %61, %65 : vector<16x32xf32>
    %67 = vector.broadcast %5 : vector<1x32xf32> to vector<16x32xf32>
    %68 = arith.mulf %66, %67 : vector<16x32xf32>
    %69 = vector.broadcast %6 : vector<1x32xf32> to vector<16x32xf32>
    %70 = arith.addf %68, %69 : vector<16x32xf32>
    %cst_21 = arith.constant 0.000000e+00 : f32
    %71 = vector.broadcast %cst_21 : f32 to vector<16x32xf32>
    %72 = arith.maximumf %70, %71 : vector<16x32xf32>
    %73 = arith.truncf %72 : vector<16x32xf32> to vector<16x32xbf16>
    %cst_22 = arith.constant dense<0.000000e+00> : vector<16x32xf32>
    %74 = tpu.matmul %73, %16, %cst_22 {dimension_numbers = #tpu.dot_dimension_numbers<[1], [0], [0], [1], [0, 0, 1, 1], [], []>} : vector<16x32xbf16>, vector<32x32xbf16>, vector<16x32xf32> -> vector<16x32xf32>
    %75 = vector.broadcast %7 : vector<1x32xf32> to vector<16x32xf32>
    %76 = arith.addf %74, %75 : vector<16x32xf32>
    %cst_23 = arith.constant dense<0.000000e+00> : vector<16x32xf32>
    %77 = tpu.matmul %20, %19, %cst_23 {dimension_numbers = #tpu.dot_dimension_numbers<[1], [0], [0], [1], [0, 0, 1, 1], [], []>} : vector<16x64xbf16>, vector<64x32xbf16>, vector<16x32xf32> -> vector<16x32xf32>
    %78 = vector.broadcast %8 : vector<1x32xf32> to vector<16x32xf32>
    %79 = arith.addf %77, %78 : vector<16x32xf32>
    %80 = arith.addf %76, %79 : vector<16x32xf32>
    %cst_24 = arith.constant dense<0.000000e+00> : vector<16xf32>
    %81 = vector.multi_reduction <add>, %80, %cst_24 [1] : vector<16x32xf32> to vector<16xf32>
    %82 = vector.shape_cast %81 : vector<16xf32> to vector<16x1xf32>
    %cst_25 = arith.constant 3.200000e+01 : f32
    %83 = vector.broadcast %cst_25 : f32 to vector<16x1xf32>
    %84 = arith.divf %82, %83 : vector<16x1xf32>
    %85 = vector.broadcast %84 : vector<16x1xf32> to vector<16x32xf32>
    %86 = arith.subf %80, %85 : vector<16x32xf32>
    %87 = arith.mulf %86, %86 : vector<16x32xf32>
    %cst_26 = arith.constant dense<0.000000e+00> : vector<16xf32>
    %88 = vector.multi_reduction <add>, %87, %cst_26 [1] : vector<16x32xf32> to vector<16xf32>
    %89 = vector.shape_cast %88 : vector<16xf32> to vector<16x1xf32>
    %cst_27 = arith.constant 3.200000e+01 : f32
    %90 = vector.broadcast %cst_27 : f32 to vector<16x1xf32>
    %91 = arith.divf %89, %90 : vector<16x1xf32>
    %92 = vector.broadcast %84 : vector<16x1xf32> to vector<16x32xf32>
    %93 = arith.subf %80, %92 : vector<16x32xf32>
    %cst_28 = arith.constant 9.99999997E-7 : f32
    %94 = vector.broadcast %cst_28 : f32 to vector<16x1xf32>
    %95 = arith.addf %91, %94 : vector<16x1xf32>
    %96 = math.rsqrt %95 : vector<16x1xf32>
    %97 = vector.broadcast %96 : vector<16x1xf32> to vector<16x32xf32>
    %98 = arith.mulf %93, %97 : vector<16x32xf32>
    %99 = vector.broadcast %9 : vector<1x32xf32> to vector<16x32xf32>
    %100 = arith.mulf %98, %99 : vector<16x32xf32>
    %101 = vector.broadcast %10 : vector<1x32xf32> to vector<16x32xf32>
    %102 = arith.addf %100, %101 : vector<16x32xf32>
    %cst_29 = arith.constant 0.000000e+00 : f32
    %103 = vector.broadcast %cst_29 : f32 to vector<16x32xf32>
    %104 = arith.maximumf %102, %103 : vector<16x32xf32>
    %105 = vector.extract_strided_slice %1 {offsets = [9, 0], sizes = [1, 32], strides = [1, 1]} : vector<27x64xf32> to vector<1x32xf32>
    %106 = vector.extract_strided_slice %1 {offsets = [10, 0], sizes = [1, 32], strides = [1, 1]} : vector<27x64xf32> to vector<1x32xf32>
    %107 = vector.extract_strided_slice %1 {offsets = [11, 0], sizes = [1, 32], strides = [1, 1]} : vector<27x64xf32> to vector<1x32xf32>
    %108 = vector.extract_strided_slice %1 {offsets = [12, 0], sizes = [1, 32], strides = [1, 1]} : vector<27x64xf32> to vector<1x32xf32>
    %109 = vector.extract_strided_slice %1 {offsets = [13, 0], sizes = [1, 32], strides = [1, 1]} : vector<27x64xf32> to vector<1x32xf32>
    %110 = vector.extract_strided_slice %1 {offsets = [14, 0], sizes = [1, 32], strides = [1, 1]} : vector<27x64xf32> to vector<1x32xf32>
    %111 = vector.extract_strided_slice %1 {offsets = [15, 0], sizes = [1, 32], strides = [1, 1]} : vector<27x64xf32> to vector<1x32xf32>
    %112 = vector.extract_strided_slice %1 {offsets = [16, 0], sizes = [1, 32], strides = [1, 1]} : vector<27x64xf32> to vector<1x32xf32>
    %113 = vector.extract_strided_slice %1 {offsets = [17, 0], sizes = [1, 32], strides = [1, 1]} : vector<27x64xf32> to vector<1x32xf32>
    %c3 = arith.constant 3 : index
    %c0_30 = arith.constant 0 : index
    %c0_31 = arith.constant 0 : index
    %114 = vector.load %arg3[%c3, %c0_30, %c0_31] : memref<9x64x64xbf16, #tpu.memory_space<vmem>>, vector<1x64x64xbf16>
    %115 = vector.shape_cast %114 : vector<1x64x64xbf16> to vector<64x64xbf16>
    %116 = vector.extract_strided_slice %115 {offsets = [0, 0], sizes = [32, 32], strides = [1, 1]} : vector<64x64xbf16> to vector<32x32xbf16>
    %c4 = arith.constant 4 : index
    %c0_32 = arith.constant 0 : index
    %c0_33 = arith.constant 0 : index
    %117 = vector.load %arg3[%c4, %c0_32, %c0_33] : memref<9x64x64xbf16, #tpu.memory_space<vmem>>, vector<1x64x64xbf16>
    %118 = vector.shape_cast %117 : vector<1x64x64xbf16> to vector<64x64xbf16>
    %119 = vector.extract_strided_slice %118 {offsets = [0, 0], sizes = [32, 32], strides = [1, 1]} : vector<64x64xbf16> to vector<32x32xbf16>
    %c5 = arith.constant 5 : index
    %c0_34 = arith.constant 0 : index
    %c0_35 = arith.constant 0 : index
    %120 = vector.load %arg3[%c5, %c0_34, %c0_35] : memref<9x64x64xbf16, #tpu.memory_space<vmem>>, vector<1x64x64xbf16>
    %121 = vector.shape_cast %120 : vector<1x64x64xbf16> to vector<64x64xbf16>
    %122 = vector.extract_strided_slice %121 {offsets = [0, 0], sizes = [32, 32], strides = [1, 1]} : vector<64x64xbf16> to vector<32x32xbf16>
    %123 = arith.truncf %104 : vector<16x32xf32> to vector<16x32xbf16>
    %cst_36 = arith.constant dense<0.000000e+00> : vector<16xf32>
    %124 = vector.multi_reduction <add>, %104, %cst_36 [1] : vector<16x32xf32> to vector<16xf32>
    %125 = vector.shape_cast %124 : vector<16xf32> to vector<16x1xf32>
    %cst_37 = arith.constant 3.200000e+01 : f32
    %126 = vector.broadcast %cst_37 : f32 to vector<16x1xf32>
    %127 = arith.divf %125, %126 : vector<16x1xf32>
    %128 = vector.broadcast %127 : vector<16x1xf32> to vector<16x32xf32>
    %129 = arith.subf %104, %128 : vector<16x32xf32>
    %130 = arith.mulf %129, %129 : vector<16x32xf32>
    %cst_38 = arith.constant dense<0.000000e+00> : vector<16xf32>
    %131 = vector.multi_reduction <add>, %130, %cst_38 [1] : vector<16x32xf32> to vector<16xf32>
    %132 = vector.shape_cast %131 : vector<16xf32> to vector<16x1xf32>
    %cst_39 = arith.constant 3.200000e+01 : f32
    %133 = vector.broadcast %cst_39 : f32 to vector<16x1xf32>
    %134 = arith.divf %132, %133 : vector<16x1xf32>
    %135 = vector.broadcast %127 : vector<16x1xf32> to vector<16x32xf32>
    %136 = arith.subf %104, %135 : vector<16x32xf32>
    %cst_40 = arith.constant 9.99999997E-7 : f32
    %137 = vector.broadcast %cst_40 : f32 to vector<16x1xf32>
    %138 = arith.addf %134, %137 : vector<16x1xf32>
    %139 = math.rsqrt %138 : vector<16x1xf32>
    %140 = vector.broadcast %139 : vector<16x1xf32> to vector<16x32xf32>
    %141 = arith.mulf %136, %140 : vector<16x32xf32>
    %142 = vector.broadcast %105 : vector<1x32xf32> to vector<16x32xf32>
    %143 = arith.mulf %141, %142 : vector<16x32xf32>
    %144 = vector.broadcast %106 : vector<1x32xf32> to vector<16x32xf32>
    %145 = arith.addf %143, %144 : vector<16x32xf32>
    %cst_41 = arith.constant 0.000000e+00 : f32
    %146 = vector.broadcast %cst_41 : f32 to vector<16x32xf32>
    %147 = arith.maximumf %145, %146 : vector<16x32xf32>
    %148 = arith.truncf %147 : vector<16x32xf32> to vector<16x32xbf16>
    %cst_42 = arith.constant dense<0.000000e+00> : vector<16x32xf32>
    %149 = tpu.matmul %148, %116, %cst_42 {dimension_numbers = #tpu.dot_dimension_numbers<[1], [0], [0], [1], [0, 0, 1, 1], [], []>} : vector<16x32xbf16>, vector<32x32xbf16>, vector<16x32xf32> -> vector<16x32xf32>
    %150 = vector.broadcast %107 : vector<1x32xf32> to vector<16x32xf32>
    %151 = arith.addf %149, %150 : vector<16x32xf32>
    %cst_43 = arith.constant dense<0.000000e+00> : vector<16xf32>
    %152 = vector.multi_reduction <add>, %151, %cst_43 [1] : vector<16x32xf32> to vector<16xf32>
    %153 = vector.shape_cast %152 : vector<16xf32> to vector<16x1xf32>
    %cst_44 = arith.constant 3.200000e+01 : f32
    %154 = vector.broadcast %cst_44 : f32 to vector<16x1xf32>
    %155 = arith.divf %153, %154 : vector<16x1xf32>
    %156 = vector.broadcast %155 : vector<16x1xf32> to vector<16x32xf32>
    %157 = arith.subf %151, %156 : vector<16x32xf32>
    %158 = arith.mulf %157, %157 : vector<16x32xf32>
    %cst_45 = arith.constant dense<0.000000e+00> : vector<16xf32>
    %159 = vector.multi_reduction <add>, %158, %cst_45 [1] : vector<16x32xf32> to vector<16xf32>
    %160 = vector.shape_cast %159 : vector<16xf32> to vector<16x1xf32>
    %cst_46 = arith.constant 3.200000e+01 : f32
    %161 = vector.broadcast %cst_46 : f32 to vector<16x1xf32>
    %162 = arith.divf %160, %161 : vector<16x1xf32>
    %163 = vector.broadcast %155 : vector<16x1xf32> to vector<16x32xf32>
    %164 = arith.subf %151, %163 : vector<16x32xf32>
    %cst_47 = arith.constant 9.99999997E-7 : f32
    %165 = vector.broadcast %cst_47 : f32 to vector<16x1xf32>
    %166 = arith.addf %162, %165 : vector<16x1xf32>
    %167 = math.rsqrt %166 : vector<16x1xf32>
    %168 = vector.broadcast %167 : vector<16x1xf32> to vector<16x32xf32>
    %169 = arith.mulf %164, %168 : vector<16x32xf32>
    %170 = vector.broadcast %108 : vector<1x32xf32> to vector<16x32xf32>
    %171 = arith.mulf %169, %170 : vector<16x32xf32>
    %172 = vector.broadcast %109 : vector<1x32xf32> to vector<16x32xf32>
    %173 = arith.addf %171, %172 : vector<16x32xf32>
    %cst_48 = arith.constant 0.000000e+00 : f32
    %174 = vector.broadcast %cst_48 : f32 to vector<16x32xf32>
    %175 = arith.maximumf %173, %174 : vector<16x32xf32>
    %176 = arith.truncf %175 : vector<16x32xf32> to vector<16x32xbf16>
    %cst_49 = arith.constant dense<0.000000e+00> : vector<16x32xf32>
    %177 = tpu.matmul %176, %119, %cst_49 {dimension_numbers = #tpu.dot_dimension_numbers<[1], [0], [0], [1], [0, 0, 1, 1], [], []>} : vector<16x32xbf16>, vector<32x32xbf16>, vector<16x32xf32> -> vector<16x32xf32>
    %178 = vector.broadcast %110 : vector<1x32xf32> to vector<16x32xf32>
    %179 = arith.addf %177, %178 : vector<16x32xf32>
    %cst_50 = arith.constant dense<0.000000e+00> : vector<16x32xf32>
    %180 = tpu.matmul %123, %122, %cst_50 {dimension_numbers = #tpu.dot_dimension_numbers<[1], [0], [0], [1], [0, 0, 1, 1], [], []>} : vector<16x32xbf16>, vector<32x32xbf16>, vector<16x32xf32> -> vector<16x32xf32>
    %181 = vector.broadcast %111 : vector<1x32xf32> to vector<16x32xf32>
    %182 = arith.addf %180, %181 : vector<16x32xf32>
    %183 = arith.addf %179, %182 : vector<16x32xf32>
    %cst_51 = arith.constant dense<0.000000e+00> : vector<16xf32>
    %184 = vector.multi_reduction <add>, %183, %cst_51 [1] : vector<16x32xf32> to vector<16xf32>
    %185 = vector.shape_cast %184 : vector<16xf32> to vector<16x1xf32>
    %cst_52 = arith.constant 3.200000e+01 : f32
    %186 = vector.broadcast %cst_52 : f32 to vector<16x1xf32>
    %187 = arith.divf %185, %186 : vector<16x1xf32>
    %188 = vector.broadcast %187 : vector<16x1xf32> to vector<16x32xf32>
    %189 = arith.subf %183, %188 : vector<16x32xf32>
    %190 = arith.mulf %189, %189 : vector<16x32xf32>
    %cst_53 = arith.constant dense<0.000000e+00> : vector<16xf32>
    %191 = vector.multi_reduction <add>, %190, %cst_53 [1] : vector<16x32xf32> to vector<16xf32>
    %192 = vector.shape_cast %191 : vector<16xf32> to vector<16x1xf32>
    %cst_54 = arith.constant 3.200000e+01 : f32
    %193 = vector.broadcast %cst_54 : f32 to vector<16x1xf32>
    %194 = arith.divf %192, %193 : vector<16x1xf32>
    %195 = vector.broadcast %187 : vector<16x1xf32> to vector<16x32xf32>
    %196 = arith.subf %183, %195 : vector<16x32xf32>
    %cst_55 = arith.constant 9.99999997E-7 : f32
    %197 = vector.broadcast %cst_55 : f32 to vector<16x1xf32>
    %198 = arith.addf %194, %197 : vector<16x1xf32>
    %199 = math.rsqrt %198 : vector<16x1xf32>
    %200 = vector.broadcast %199 : vector<16x1xf32> to vector<16x32xf32>
    %201 = arith.mulf %196, %200 : vector<16x32xf32>
    %202 = vector.broadcast %112 : vector<1x32xf32> to vector<16x32xf32>
    %203 = arith.mulf %201, %202 : vector<16x32xf32>
    %204 = vector.broadcast %113 : vector<1x32xf32> to vector<16x32xf32>
    %205 = arith.addf %203, %204 : vector<16x32xf32>
    %cst_56 = arith.constant 0.000000e+00 : f32
    %206 = vector.broadcast %cst_56 : f32 to vector<16x32xf32>
    %207 = arith.maximumf %205, %206 : vector<16x32xf32>
    %208 = vector.extract_strided_slice %1 {offsets = [18, 0], sizes = [1, 32], strides = [1, 1]} : vector<27x64xf32> to vector<1x32xf32>
    %209 = vector.extract_strided_slice %1 {offsets = [19, 0], sizes = [1, 32], strides = [1, 1]} : vector<27x64xf32> to vector<1x32xf32>
    %210 = vector.extract_strided_slice %1 {offsets = [20, 0], sizes = [1, 32], strides = [1, 1]} : vector<27x64xf32> to vector<1x32xf32>
    %211 = vector.extract_strided_slice %1 {offsets = [21, 0], sizes = [1, 32], strides = [1, 1]} : vector<27x64xf32> to vector<1x32xf32>
    %212 = vector.extract_strided_slice %1 {offsets = [22, 0], sizes = [1, 32], strides = [1, 1]} : vector<27x64xf32> to vector<1x32xf32>
    %213 = vector.extract_strided_slice %1 {offsets = [23, 0], sizes = [1, 32], strides = [1, 1]} : vector<27x64xf32> to vector<1x32xf32>
    %214 = vector.extract_strided_slice %1 {offsets = [24, 0], sizes = [1, 32], strides = [1, 1]} : vector<27x64xf32> to vector<1x32xf32>
    %215 = vector.extract_strided_slice %1 {offsets = [25, 0], sizes = [1, 32], strides = [1, 1]} : vector<27x64xf32> to vector<1x32xf32>
    %216 = vector.extract_strided_slice %1 {offsets = [26, 0], sizes = [1, 32], strides = [1, 1]} : vector<27x64xf32> to vector<1x32xf32>
    %c6 = arith.constant 6 : index
    %c0_57 = arith.constant 0 : index
    %c0_58 = arith.constant 0 : index
    %217 = vector.load %arg3[%c6, %c0_57, %c0_58] : memref<9x64x64xbf16, #tpu.memory_space<vmem>>, vector<1x64x64xbf16>
    %218 = vector.shape_cast %217 : vector<1x64x64xbf16> to vector<64x64xbf16>
    %219 = vector.extract_strided_slice %218 {offsets = [0, 0], sizes = [32, 32], strides = [1, 1]} : vector<64x64xbf16> to vector<32x32xbf16>
    %c7 = arith.constant 7 : index
    %c0_59 = arith.constant 0 : index
    %c0_60 = arith.constant 0 : index
    %220 = vector.load %arg3[%c7, %c0_59, %c0_60] : memref<9x64x64xbf16, #tpu.memory_space<vmem>>, vector<1x64x64xbf16>
    %221 = vector.shape_cast %220 : vector<1x64x64xbf16> to vector<64x64xbf16>
    %222 = vector.extract_strided_slice %221 {offsets = [0, 0], sizes = [32, 32], strides = [1, 1]} : vector<64x64xbf16> to vector<32x32xbf16>
    %c8 = arith.constant 8 : index
    %c0_61 = arith.constant 0 : index
    %c0_62 = arith.constant 0 : index
    %223 = vector.load %arg3[%c8, %c0_61, %c0_62] : memref<9x64x64xbf16, #tpu.memory_space<vmem>>, vector<1x64x64xbf16>
    %224 = vector.shape_cast %223 : vector<1x64x64xbf16> to vector<64x64xbf16>
    %225 = vector.extract_strided_slice %224 {offsets = [0, 0], sizes = [32, 32], strides = [1, 1]} : vector<64x64xbf16> to vector<32x32xbf16>
    %226 = arith.truncf %207 : vector<16x32xf32> to vector<16x32xbf16>
    %cst_63 = arith.constant dense<0.000000e+00> : vector<16xf32>
    %227 = vector.multi_reduction <add>, %207, %cst_63 [1] : vector<16x32xf32> to vector<16xf32>
    %228 = vector.shape_cast %227 : vector<16xf32> to vector<16x1xf32>
    %cst_64 = arith.constant 3.200000e+01 : f32
    %229 = vector.broadcast %cst_64 : f32 to vector<16x1xf32>
    %230 = arith.divf %228, %229 : vector<16x1xf32>
    %231 = vector.broadcast %230 : vector<16x1xf32> to vector<16x32xf32>
    %232 = arith.subf %207, %231 : vector<16x32xf32>
    %233 = arith.mulf %232, %232 : vector<16x32xf32>
    %cst_65 = arith.constant dense<0.000000e+00> : vector<16xf32>
    %234 = vector.multi_reduction <add>, %233, %cst_65 [1] : vector<16x32xf32> to vector<16xf32>
    %235 = vector.shape_cast %234 : vector<16xf32> to vector<16x1xf32>
    %cst_66 = arith.constant 3.200000e+01 : f32
    %236 = vector.broadcast %cst_66 : f32 to vector<16x1xf32>
    %237 = arith.divf %235, %236 : vector<16x1xf32>
    %238 = vector.broadcast %230 : vector<16x1xf32> to vector<16x32xf32>
    %239 = arith.subf %207, %238 : vector<16x32xf32>
    %cst_67 = arith.constant 9.99999997E-7 : f32
    %240 = vector.broadcast %cst_67 : f32 to vector<16x1xf32>
    %241 = arith.addf %237, %240 : vector<16x1xf32>
    %242 = math.rsqrt %241 : vector<16x1xf32>
    %243 = vector.broadcast %242 : vector<16x1xf32> to vector<16x32xf32>
    %244 = arith.mulf %239, %243 : vector<16x32xf32>
    %245 = vector.broadcast %208 : vector<1x32xf32> to vector<16x32xf32>
    %246 = arith.mulf %244, %245 : vector<16x32xf32>
    %247 = vector.broadcast %209 : vector<1x32xf32> to vector<16x32xf32>
    %248 = arith.addf %246, %247 : vector<16x32xf32>
    %cst_68 = arith.constant 0.000000e+00 : f32
    %249 = vector.broadcast %cst_68 : f32 to vector<16x32xf32>
    %250 = arith.maximumf %248, %249 : vector<16x32xf32>
    %251 = arith.truncf %250 : vector<16x32xf32> to vector<16x32xbf16>
    %cst_69 = arith.constant dense<0.000000e+00> : vector<16x32xf32>
    %252 = tpu.matmul %251, %219, %cst_69 {dimension_numbers = #tpu.dot_dimension_numbers<[1], [0], [0], [1], [0, 0, 1, 1], [], []>} : vector<16x32xbf16>, vector<32x32xbf16>, vector<16x32xf32> -> vector<16x32xf32>
    %253 = vector.broadcast %210 : vector<1x32xf32> to vector<16x32xf32>
    %254 = arith.addf %252, %253 : vector<16x32xf32>
    %cst_70 = arith.constant dense<0.000000e+00> : vector<16xf32>
    %255 = vector.multi_reduction <add>, %254, %cst_70 [1] : vector<16x32xf32> to vector<16xf32>
    %256 = vector.shape_cast %255 : vector<16xf32> to vector<16x1xf32>
    %cst_71 = arith.constant 3.200000e+01 : f32
    %257 = vector.broadcast %cst_71 : f32 to vector<16x1xf32>
    %258 = arith.divf %256, %257 : vector<16x1xf32>
    %259 = vector.broadcast %258 : vector<16x1xf32> to vector<16x32xf32>
    %260 = arith.subf %254, %259 : vector<16x32xf32>
    %261 = arith.mulf %260, %260 : vector<16x32xf32>
    %cst_72 = arith.constant dense<0.000000e+00> : vector<16xf32>
    %262 = vector.multi_reduction <add>, %261, %cst_72 [1] : vector<16x32xf32> to vector<16xf32>
    %263 = vector.shape_cast %262 : vector<16xf32> to vector<16x1xf32>
    %cst_73 = arith.constant 3.200000e+01 : f32
    %264 = vector.broadcast %cst_73 : f32 to vector<16x1xf32>
    %265 = arith.divf %263, %264 : vector<16x1xf32>
    %266 = vector.broadcast %258 : vector<16x1xf32> to vector<16x32xf32>
    %267 = arith.subf %254, %266 : vector<16x32xf32>
    %cst_74 = arith.constant 9.99999997E-7 : f32
    %268 = vector.broadcast %cst_74 : f32 to vector<16x1xf32>
    %269 = arith.addf %265, %268 : vector<16x1xf32>
    %270 = math.rsqrt %269 : vector<16x1xf32>
    %271 = vector.broadcast %270 : vector<16x1xf32> to vector<16x32xf32>
    %272 = arith.mulf %267, %271 : vector<16x32xf32>
    %273 = vector.broadcast %211 : vector<1x32xf32> to vector<16x32xf32>
    %274 = arith.mulf %272, %273 : vector<16x32xf32>
    %275 = vector.broadcast %212 : vector<1x32xf32> to vector<16x32xf32>
    %276 = arith.addf %274, %275 : vector<16x32xf32>
    %cst_75 = arith.constant 0.000000e+00 : f32
    %277 = vector.broadcast %cst_75 : f32 to vector<16x32xf32>
    %278 = arith.maximumf %276, %277 : vector<16x32xf32>
    %279 = arith.truncf %278 : vector<16x32xf32> to vector<16x32xbf16>
    %cst_76 = arith.constant dense<0.000000e+00> : vector<16x32xf32>
    %280 = tpu.matmul %279, %222, %cst_76 {dimension_numbers = #tpu.dot_dimension_numbers<[1], [0], [0], [1], [0, 0, 1, 1], [], []>} : vector<16x32xbf16>, vector<32x32xbf16>, vector<16x32xf32> -> vector<16x32xf32>
    %281 = vector.broadcast %213 : vector<1x32xf32> to vector<16x32xf32>
    %282 = arith.addf %280, %281 : vector<16x32xf32>
    %cst_77 = arith.constant dense<0.000000e+00> : vector<16x32xf32>
    %283 = tpu.matmul %226, %225, %cst_77 {dimension_numbers = #tpu.dot_dimension_numbers<[1], [0], [0], [1], [0, 0, 1, 1], [], []>} : vector<16x32xbf16>, vector<32x32xbf16>, vector<16x32xf32> -> vector<16x32xf32>
    %284 = vector.broadcast %214 : vector<1x32xf32> to vector<16x32xf32>
    %285 = arith.addf %283, %284 : vector<16x32xf32>
    %286 = arith.addf %282, %285 : vector<16x32xf32>
    %cst_78 = arith.constant dense<0.000000e+00> : vector<16xf32>
    %287 = vector.multi_reduction <add>, %286, %cst_78 [1] : vector<16x32xf32> to vector<16xf32>
    %288 = vector.shape_cast %287 : vector<16xf32> to vector<16x1xf32>
    %cst_79 = arith.constant 3.200000e+01 : f32
    %289 = vector.broadcast %cst_79 : f32 to vector<16x1xf32>
    %290 = arith.divf %288, %289 : vector<16x1xf32>
    %291 = vector.broadcast %290 : vector<16x1xf32> to vector<16x32xf32>
    %292 = arith.subf %286, %291 : vector<16x32xf32>
    %293 = arith.mulf %292, %292 : vector<16x32xf32>
    %cst_80 = arith.constant dense<0.000000e+00> : vector<16xf32>
    %294 = vector.multi_reduction <add>, %293, %cst_80 [1] : vector<16x32xf32> to vector<16xf32>
    %295 = vector.shape_cast %294 : vector<16xf32> to vector<16x1xf32>
    %cst_81 = arith.constant 3.200000e+01 : f32
    %296 = vector.broadcast %cst_81 : f32 to vector<16x1xf32>
    %297 = arith.divf %295, %296 : vector<16x1xf32>
    %298 = vector.broadcast %290 : vector<16x1xf32> to vector<16x32xf32>
    %299 = arith.subf %286, %298 : vector<16x32xf32>
    %cst_82 = arith.constant 9.99999997E-7 : f32
    %300 = vector.broadcast %cst_82 : f32 to vector<16x1xf32>
    %301 = arith.addf %297, %300 : vector<16x1xf32>
    %302 = math.rsqrt %301 : vector<16x1xf32>
    %303 = vector.broadcast %302 : vector<16x1xf32> to vector<16x32xf32>
    %304 = arith.mulf %299, %303 : vector<16x32xf32>
    %305 = vector.broadcast %215 : vector<1x32xf32> to vector<16x32xf32>
    %306 = arith.mulf %304, %305 : vector<16x32xf32>
    %307 = vector.broadcast %216 : vector<1x32xf32> to vector<16x32xf32>
    %308 = arith.addf %306, %307 : vector<16x32xf32>
    %c0_83 = arith.constant 0 : index
    %c0_84 = arith.constant 0 : index
    %309 = vector.load %arg4[%c0_83, %c0_84] : memref<16x32xf32, #tpu.memory_space<vmem>>, vector<16x32xf32>
    tpu.vector_store %arg4[%c0_83, %c0_84], %308 {strides = array<i32>} : memref<16x32xf32, #tpu.memory_space<vmem>>, vector<16x32xf32>,
    return
  }
  func.func @transform_0(%arg0: i32) -> (i32, i32) {
    %c0_i32 = arith.constant 0 : i32
    %c0_i32_0 = arith.constant 0 : i32
    return %arg0, %c0_i32 : i32, i32
  }
  func.func @transform_1(%arg0: i32) -> (i32, i32) {
    %c0_i32 = arith.constant 0 : i32
    %c0_i32_0 = arith.constant 0 : i32
    %c0_i32_1 = arith.constant 0 : i32
    return %c0_i32, %c0_i32_0 : i32, i32
  }
  func.func @transform_2(%arg0: i32) -> (i32, i32, i32) {
    %c0_i32 = arith.constant 0 : i32
    %c0_i32_0 = arith.constant 0 : i32
    %c0_i32_1 = arith.constant 0 : i32
    %c0_i32_2 = arith.constant 0 : i32
    return %c0_i32, %c0_i32_0, %c0_i32_1 : i32, i32, i32
  }
  func.func @transform_3(%arg0: i32) -> (i32, i32) {
    %c0_i32 = arith.constant 0 : i32
    %c0_i32_0 = arith.constant 0 : i32
    return %arg0, %c0_i32 : i32, i32
  }
}

</mosaic_0001>

<bundles_post_ra>
// kernel: tpu_custom_call.1
= control target key start
LH: loop header
LB: loop body
LE: loop exit
PB: predicated region body
PF: predicated region fallthrough
CT: control target
= control target key end

     0   :  { %8 = vsyncpa [#allocation3], 0  ;;  %s2281_s0 = inlined_call_operand.hbm [shape: f32[32,64], index: 0, kind: input, shape index: {}]   ;;  %s2282_s1 = inlined_call_operand.hbm [shape: f32[27,64], index: 1, kind: input, shape index: {}]   ;;  %s2283_s2 = inlined_call_operand.hbm [shape: bf16[9,64,64], index: 2, kind: input, shape index: {}]   ;;  %s2284_s3 = inlined_call_operand.hbm [shape: f32[32,32], index: 3, kind: output, shape index: {}]  }
   0x1   :  { %10 = vsyncpa [#allocation3 + $0x1], 0 }
   0x2   :  { %11 = vsyncpa [#allocation6], 0 }
   0x3   :  { %12 = vsyncpa [#allocation4], 0 }
   0x4   :  { %14 = vsyncpa [#allocation4 + $0x1], 0  ;;  %s1837_s12 = smov 0   ;;  %s1839_s13 = smov 0  }
   0x5   :  { %s1841_s14 = smov 0   ;;  %s1843_s15 = smov 0  }
   0x6 LB: > { %s1858_s16 = sadd.s32 4294967295, %s1803_s15   ;;  %s1328_s17 = sadd.s32 4294967294, %s1803_s15   ;;  %s1803_s15 = sphi %s1843_s15, %s2304_s15   ;;  %s1799_s14 = sphi %s1841_s14, %s2303_s14   ;;  %s1795_s13 = sphi %s1839_s13, %s2302_s13   ;;  %s1791_s12 = sphi %s1837_s12, %s2301_s12  }
   0x7   : > { %p40_p0 = scmp.ne.s32.totalorder %s1795_s13, %s1791_s12  ;;  %p2285_p1 = scmp.eq.s32.totalorder %s1858_s16, 0 }
   0x8   : > { %p112_p3 = scmp.eq.s32.totalorder %s1328_s17, 1  ;;  %p1329_p5 = scmp.ge.s32.totalorder %s1803_s15, 1 }
   0x9   : > { %p1867_p4 = por %p2285_p1, %p40_p0  ;;  %p119_p7 = scmp.lt.s32.totalorder %s1803_s15, 3 }
   0xa   : > { %p1872_p6 = por %p112_p3, %p40_p0  ;;  %s1805_s21 = smov [#allocation5]  }
   0xb   : > { %s2288_s18 = scalar_select %p1867_p4, 1, 0 }
   0xc   : > { %s2289_s19 = scalar_select %p1872_p6, 1, 0 }
   0xd   : > { %p1877_p8 = pnand %p1329_p5, %p119_p7  ;;  %s131_s22 = sshll.u32 %s1805_s21, 4  ;;  %s1881_s22 = int_to_ptr.vmem [resolvable:$true] %s131_s22 }
   0xe   : > { %s1806_s24 = smov [#allocation7]   ;;  %s1647_s28 = scalar_lea.hbm %s2282_s1, 512 }
   0xf   : > { %p1526_p9 = pneg %p1877_p8  ;;  %s144_s25 = sshll.u32 %s1806_s24, 4  ;;  %s1892_s25 = int_to_ptr.vmem [resolvable:$true] %s144_s25 }
  0x10   : > { %p1648_p12 = scmp.ne.s32.totalorder %s2282_s1, %s1647_s28  ;;  %p1654_p5 = scmp.lt.u32.totalorder %s1647_s28, %s2282_s1 }
  0x11   : > { %p1888_p11 = pnand %p1526_p9, %p2285_p1 }
  0x13   : > { %p1649_p13 = pneg %p1888_p11 }
  0x15   : > { %p1650_p0 = pnand %p1649_p13, %p1648_p12 }
  0x17   : > { %p1651_p3 = pneg %p1650_p0 }
  0x19   : > { %p1656_p7 = pnand %p1654_p5, %p1651_p3 }
  0x1b   : > { %1659 = shalt.err (!%p1656_p7)
}
  0x1c   : > { %s1660_s6 = scalar_lea.vmem %s1881_s22, 512  ;;  %p1668_p2 = scmp.lt.s32.totalorder %s1881_s22, %s1881_s22 }
  0x1d   : > { %p1661_p9 = scmp.ne.s32.totalorder %s1881_s22, %s1660_s6  ;;  %p1669_p12 = scmp.lt.s32.totalorder %s1660_s6, %s1660_s6 }
  0x1f   : > { %p1663_p10 = pnand %p1661_p9, %p1649_p13  ;;  %p1670_p0 = por %p1669_p12, %p1668_p2 }
  0x21   : > { %p1664_p1 = pneg %p1663_p10 }
  0x23   : > { %p1671_p6 = pnand %p1670_p0, %p1664_p1 }
  0x25   : > { %1674 = shalt.err (!%p1671_p6)
}
  0x26   : > { %s1807_s7 = smov 128   ;;  %s1808_s8 = smov 8  }
  0x27   : > { %1529 = dma.hbm_to_vmem [thread:$0]  (!%p1888_p11), %s2282_s1, 512, %s1881_s22, [#allocation6], %s1807_s7, %s1807_s7, %s1808_s8  }
  0x28   : > { %s1675_s21 = scalar_lea.hbm %s2283_s2, 4608 }
  0x29   : > { %p1676_p1 = scmp.ne.s32.totalorder %s2283_s2, %s1675_s21  ;;  %p1682_p10 = scmp.lt.u32.totalorder %s1675_s21, %s2283_s2 }
  0x2b   : > { %p1678_p2 = pnand %p1676_p1, %p1649_p13 }
  0x2d   : > { %p1679_p6 = pneg %p1678_p2 }
  0x2f   : > { %p1684_p3 = pnand %p1682_p10, %p1679_p6 }
  0x31   : > { %1687 = shalt.err (!%p1684_p3)
}
  0x32   : > { %s1688_s22 = scalar_lea.vmem %s1892_s25, 4608  ;;  %p1696_p12 = scmp.lt.s32.totalorder %s1892_s25, %s1892_s25 }
  0x33   : > { %p1689_p5 = scmp.ne.s32.totalorder %s1892_s25, %s1688_s22  ;;  %p1697_p0 = scmp.lt.s32.totalorder %s1688_s22, %s1688_s22 }
  0x35   : > { %p1691_p7 = pnand %p1689_p5, %p1649_p13  ;;  %p1698_p1 = por %p1697_p0, %p1696_p12 }
  0x37   : > { %p1692_p9 = pneg %p1691_p7 }
  0x39   : > { %p1699_p2 = pnand %p1698_p1, %p1692_p9 }
  0x3b   : > { %1702 = shalt.err (!%p1699_p2)
}
  0x3c   : > { %s1809_s29 = smov 64   ;;  %s1810_s30 = smov 4  }
  0x3d   : > { %1532 = dma.hbm_to_vmem [thread:$0]  (!%p1888_p11), %s2283_s2, 4608, %s1892_s25, [#allocation6], %s1809_s29, %s1809_s29, %s1810_s30  }
  0x3e   : > { %s1950_s6 = sadd.s32 1, %s1803_s15   ;;  %s27_s10 = sadd.s32 1, %s1799_s14 }
  0x3f   : > { %s24_s9 = ssub.s32 %s1803_s15, %s1950_s6  ;;  %p34_p6 = scmp.ne.s32.totalorder %s1799_s14, %s1795_s13 }
  0x40   : > { %p25_p13 = scmp.eq.s32.totalorder %s24_s9, 0  ;;  %p35_p10 = scmp.eq.s32.totalorder %s1803_s15, 0 }
  0x41   : > { %p2292_p5 = scmp.eq.s32.totalorder %s1858_s16, 1  ;;  %p1543_p9 = scmp.lt.s32.totalorder %s1803_s15, 2 }
  0x42   : > { %s1959_s11 = scalar_select %p25_p13, %s1799_s14, %s27_s10  }
  0x43   : > { %p36_p3 = por %p35_p10, %p34_p6  ;;  %p1963_p7 = por %p2292_p5, %p34_p6 }
  0x44   : > { %s158_s23 = sand.u32 1, %s1799_s14   ;;  %s1377_s25 = sshll.u32 %s1803_s15, 8 }
  0x45   : > { %s2293_s17 = scalar_select %p1963_p7, 1, 0 }
  0x46   : > { %s1333_s21 = sshll.u32 %s158_s23, 4  ;;  %s1973_s27 = scalar_lea.hbm %s2281_s0, %s1377_s25 }
  0x47   : > { %s162_s28 = scalar_lea.vmem [#allocation2], %s1333_s21  ;;  %p1977_p11 = pnand %p1543_p9, %p36_p3 }
  0x48   : > { %s169_s22 = sshll.u32 %s162_s28, 4  ;;  %s1981_s30 = scalar_lea.sflag [#allocation3], %s158_s23  ;;  %s1975_s22 = int_to_ptr.vmem [resolvable:$true] %s169_s22 }
  0x49   : > { %s1703_s4 = scalar_lea.hbm %s1973_s27, 256  ;;  %p1705_p0 = pneg %p1977_p11 }
  0x4a   : > { %p1704_p12 = scmp.ne.s32.totalorder %s1973_s27, %s1703_s4  ;;  %s1708_s10 = scalar_lea.hbm %s2281_s0, 512 }
  0x4b   : > { %p1709_p13 = scmp.lt.u32.totalorder %s1973_s27, %s2281_s0  ;;  %p1710_p6 = scmp.lt.u32.totalorder %s1708_s10, %s1703_s4 }
  0x4c   : > { %p1706_p1 = pnand %p1705_p0, %p1704_p12  ;;  %p1712_p3 = scmp.lt.u32.totalorder %s1703_s4, %s1973_s27 }
  0x4d   : > { %p1711_p10 = por %p1710_p6, %p1709_p13 }
  0x4e   : > { %p1707_p2 = pneg %p1706_p1 }
  0x4f   : > { %p1713_p5 = por %p1712_p3, %p1711_p10 }
  0x51   : > { %p1714_p9 = pnand %p1713_p5, %p1707_p2 }
  0x53   : > { %1717 = shalt.err (!%p1714_p9)
}
  0x54   : > { %s1718_s23 = scalar_lea.vmem %s1975_s22, 256  ;;  %s1811_s24 = smov [#allocation2]  }
  0x55   : > { %p1719_p12 = scmp.ne.s32.totalorder %s1975_s22, %s1718_s23  ;;  %s1723_s26 = sshll.u32 %s1811_s24, 4  ;;  %s1724_s26 = int_to_ptr.vmem [resolvable:$false] %s1723_s26 }
  0x56   : > { %s1725_s28 = scalar_lea.vmem %s1724_s26, 512  ;;  %p1726_p4 = scmp.lt.s32.totalorder %s1975_s22, %s1724_s26 }
  0x57   : > { %p1721_p1 = pnand %p1719_p12, %p1705_p0  ;;  %p1727_p13 = scmp.lt.s32.totalorder %s1725_s28, %s1718_s23 }
  0x59   : > { %p1722_p7 = pneg %p1721_p1  ;;  %p1728_p6 = por %p1727_p13, %p1726_p4 }
  0x5b   : > { %p1729_p10 = pnand %p1728_p6, %p1722_p7 }
  0x5d   : > { %1732 = shalt.err (!%p1729_p10)
}
  0x5e   : > { %1536 = dma.hbm_to_vmem [thread:$0]  (!%p1977_p11), %s1973_s27, 256, %s1975_s22, %s1981_s30, %s1807_s7, %s1807_s7, %s1808_s8  }
  0x5f   : > { %181 = sbr.rel (%p1877_p8) target bundleno = 4307 (0x10d3), region = 32  ;;  %s2015_s4 = sand.u32 (!%p1877_p8), 1, %s1795_s13  }
  0x60   : > { %s1337_s5 = sshll.u32 (!%p1877_p8), %s2015_s4, 4  ;;  %s184_s9 = scalar_lea.sflag (!%p1877_p8), [#allocation3], %s2015_s4 }
  0x61   : > { %s187_s29 = scalar_lea.vmem (!%p1877_p8), [#allocation2], %s1337_s5  ;;  %p2295_p4 = scmp.ne.s32.totalorder (!%p1877_p8), %s2288_s18, 0 }
  0x66   : > { %1778 = dma.done.wait (%p2295_p4), %s184_s9, 256  }
  0x67   : > { %1780 = vsyncadd (%p2295_p4), %s184_s9, 4294967040  ;;  %p2296_p7 = scmp.eq.s32.totalorder %s1858_s16, 0 }
  0x69   : > { %1782 = dma.done.wait (%p2296_p7), [#allocation6], 5120   ;;  %p2297_p8 = pmov %p2296_p7 }
  0x6a   : > { %vm250_vm0 = vcmask 523264   ;;  %v2029_v0 = vld [vmem:[%s187_s29] sm:$0xff]  ;;  %v2031_v1 = vld [vmem:[%s187_s29 + $0x8] sm:$0xff]  ;;  %v1812_v15 = vmov 0.0   ;;  %vm1813_vm1 = vmmov 0   ;;  %v278_v21 = vlaneseq  ;;  %s1378_s18 = sshll.u32 %s1858_s16, 8 }
  0x6b   : > { %1784 = vsyncadd (%p2297_p8), [#allocation6], 4294962176  ;;  %v251_v2 = vsel %vm250_vm0, %v2029_v0, 0.0  ;;  %v254_v3 = vsel %vm250_vm0, %v2031_v1, 0.0  ;;  %v1589_v14 = vld [vmem:[#allocation7] sm:$0xff]   ;;  %1410 = vmatprep.subr.bf16.mxu0 %v1812_v15  ;;  %1422 = vmatprep.subr.bf16.mxu1 %v1812_v15  ;;  %v1590_v16 = vld [vmem:[#allocation7 + $0x8] sm:$0xff]   ;;  %s2233_s22 = scalar_lea.hbm %s2284_s3, %s1378_s18 }
  0x6c   : > { %252 = vadd.xlane.f32.xlu0 %v251_v2  ;;  %1411 = vmatpush3.bf16.msra.mxu0 %v1589_v14  ;;  %v1591_v17 = vld [vmem:[#allocation7 + $0x10] sm:$0xff]   ;;  %v1592_v18 = vld [vmem:[#allocation7 + $0x18] sm:$0xff]   ;;  %v2051_v25 = vshrl.u32 %v278_v21, 7  ;;  %v2056_v28 = vld [vmem:[#allocation5] sm:$0xff]  ;;  %vm365_vm2 = vcmask 261120   ;;  %s217_s20 = scalar_lea.vmem [#allocation8], %s1337_s5 }
  0x6d   : > { %1412 = vmatprep.subr.bf16.mxu0 %v1812_v15  ;;  %1418 = vmatprep.mubr.msk.bf16.mxu0 %vm1813_vm1, %v1812_v15  ;;  %v1593_v63 = vld [vmem:[#allocation7 + $0x20] sm:$0xff]   ;;  %v1594_v2 = vld [vmem:[#allocation7 + $0x28] sm:$0xff]   ;;  %s1236_s7 = sshll.u32 %s217_s20, 4  ;;  %s1223_s16 = scalar_lea.sflag [#allocation4], %s2015_s4  ;;  %s2235_s7 = int_to_ptr.vmem [resolvable:$true] %s1236_s7 }
  0x6e   : > { %1426 = vmatprep.mubr.msk.bf16.mxu1 %vm1813_vm1, %v1812_v15  ;;  %v2054_v27 = vsub.s32 0, %v2051_v25  ;;  %v2061_v30 = vsub.s32 1, %v2051_v25  ;;  %v2069_v43 = vsub.s32 2, %v2051_v25  ;;  %1423 = vmatpush3.bf16.msra.mxu1 %v1593_v63  ;;  %v2118_v63 = vld [vmem:[#allocation5 + $0x8] sm:$0xff]  ;;  %s1733_s30 = scalar_lea.vmem %s2235_s7, 256  ;;  %p2298_p0 = scmp.ne.s32.totalorder %s2293_s17, 0 }
  0x6f   : > { %1424 = vmatprep.subr.bf16.mxu1 %v1812_v15  ;;  %p1734_p11 = scmp.ne.s32.totalorder %s2235_s7, %s1733_s30  ;;  %s1814_s10 = smov [#allocation8]  }
  0x70   : > { %255 = vadd.xlane.f32.xlu0 %v254_v3  ;;  %1413 = vmatpush3.bf16.msra.mxu0 %v1590_v16  ;;  %v281_v29 = vrot.slane %v2056_v28, %v2054_v27  ;;  %v287_v34 = vrot.slane %v2056_v28, %v2061_v30  ;;  %v296_v44 = vrot.slane %v2056_v28, %v2069_v43  ;;  %s1737_s21 = sshll.u32 %s1814_s10, 4  ;;  %s1738_s21 = int_to_ptr.vmem [resolvable:$false] %s1737_s21 }
  0x71   : > { %1414 = vmatprep.subr.bf16.mxu0 %v1812_v15  ;;  %p1735_p2 = pnand %p1734_p11, %p2298_p0  ;;  %s1739_s25 = scalar_lea.vmem %s1738_s21, 512 }
  0x72   : > { %1425 = vmatpush3.bf16.msra.mxu1 %v1594_v2  ;;  %p1740_p5 = scmp.lt.s32.totalorder %s2235_s7, %s1738_s21  ;;  %p1741_p9 = scmp.lt.s32.totalorder %s1739_s25, %s1733_s30 }
  0x73   : > { %1430 = vmatprep.subr.bf16.mxu1 %v1812_v15  ;;  %p1736_p3 = pneg %p1735_p2 }
  0x74   : > { %1415 = vmatpush3.bf16.msra.mxu0 %v1591_v17  ;;  %p1742_p12 = por %p1741_p9, %p1740_p5 }
  0x75   : > { %1416 = vmatprep.subr.bf16.mxu0 %v1812_v15 }
  0x76   : > { %p1743_p1 = pnand %p1742_p12, %p1736_p3 }
  0x78   : > { %1417 = vmatpush3.bf16.msra.mxu0 %v1592_v18 }
  0x79   : > { %1442 = vmatprep.subr.bf16.mxu0 %v1812_v15 }
  0xf9   : > { %v253_v4 = vpop.xlane.xlu0 %252 }
  0xfa   : > { %v258_v5 = vmul.f32 0.015625, %v253_v4 }
  0xfc   : > { %v260_v6 = vsub.f32 %v2029_v0, %v258_v5 }
  0xfd   : > { %v256_v7 = vpop.xlane.xlu0 %255 }
  0xfe   : > { %v259_v8 = vmul.f32 0.015625, %v256_v7  ;;  %v262_v9 = vmul.f32 %v260_v6, %v260_v6 }
 0x100   : > { %v261_v10 = vsub.f32 %v2031_v1, %v259_v8  ;;  %v264_v11 = vsel %vm250_vm0, %v262_v9, 0.0  ;;  %v2080_v9 = vsub.s32 3, %v2051_v25 }
 0x101   : > { %265 = vadd.xlane.f32.xlu1 %v264_v11 }
 0x102   : > { %v263_v12 = vmul.f32 %v261_v10, %v261_v10  ;;  %v396_v11 = vrot.slane %v2056_v28, %v2080_v9 }
 0x104   : > { %v267_v13 = vsel %vm250_vm0, %v263_v12, 0.0 }
 0x105   : > { %268 = vadd.xlane.f32.xlu1 %v267_v13 }
 0x18e   : > { %v266_v19 = vpop.xlane.xlu1 %265 }
 0x18f   : > { %v270_v20 = vmul.f32 0.015625, %v266_v19 }
 0x191   : > { %v272_v22 = vadd.f32 1e-06, %v270_v20 }
 0x192   : > { %v269_v23 = vpop.xlane.xlu1 %268 }
 0x193   : > { %1611 = vrsqrt.f32 %v272_v22  ;;  %v271_v24 = vmul.f32 0.015625, %v269_v23 }
 0x195   : > { %v273_v26 = vadd.f32 1e-06, %v271_v24  ;;  %v1595_v24 = vld [vmem:[#allocation7 + $0x40] sm:$0xff]  }
 0x197   : > { %1613 = vrsqrt.f32 %v273_v26 }
 0x19d   : > { %v1612_v31 = vpop.eup %1611 }
 0x19e   : > { %v276_v32 = vmul.f32 %v1612_v31, %v260_v6  ;;  %v1597_v31 = vld [vmem:[#allocation7 + $0x50] sm:$0xff]  }
 0x1a0   : > { %v282_v33 = vmul.f32 %v281_v29, %v276_v32  ;;  %v1598_v32 = vld [vmem:[#allocation7 + $0x58] sm:$0xff]  }
 0x1a1   : > { %v1614_v35 = vpop.eup %1613 }
 0x1a2   : > { %v277_v36 = vmul.f32 %v1614_v35, %v261_v10  ;;  %v288_v38 = vadd.f32 %v287_v34, %v282_v33  ;;  %v2083_v10 = vsub.s32 4, %v2051_v25  ;;  %v249_v33 = vpack.c.bf16 %v2031_v1, %v2029_v0 }
 0x1a3   : > { %v2105_v35 = vsub.s32 6, %v2051_v25 }
 0x1a4   : > { %v283_v37 = vmul.f32 %v281_v29, %v277_v36  ;;  %v290_v40 = vmax.f32 %v288_v38, 0.0  ;;  %v402_v14 = vrot.slane %v2056_v28, %v2083_v10  ;;  %v1596_v29 = vld [vmem:[#allocation7 + $0x48] sm:$0xff]  }
 0x1a5   : > { %v471_v0 = vrot.slane %v2056_v28, %v2105_v35 }
 0x1a6   : > { %v289_v39 = vadd.f32 %v287_v34, %v283_v37  ;;  %v2102_v34 = vsub.s32 5, %v2051_v25 }
 0x1a8   : > { %v291_v41 = vmax.f32 %v289_v39, 0.0  ;;  %v411_v36 = vrot.slane %v2056_v28, %v2102_v34 }
 0x1aa   : > { %v292_v42 = vpack.c.bf16 %v291_v41, %v290_v40  ;;  %v1490_v1 = vadd.f32 %v471_v0, %v411_v36 }
 0x1ac   : > { %1419 = vmatmul.mubr.msk.bf16.vlgmr.msra.gmra.mrb[0].mxu0 %vm250_vm0, %v292_v42 }
 0x1ad   : > { %1446 = vmatprep.mubr.msk.bf16.mxu0 %vm1813_vm1, %v1812_v15 }
 0x27f   : > { %v358_v45 = vpop.f32.mrb[0].mxu0 }
 0x280   : > { %v359_v46 = vadd.f32 %v358_v45, %v296_v44  ;;  %v1420_v47 = vpop.f32.mrb[1].mxu0 }
 0x281   : > { %v361_v48 = vpop.f32.mrb[2].mxu0 }
 0x282   : > { %v362_v49 = vadd.f32 %v361_v48, %v296_v44  ;;  %v1421_v50 = vpop.f32.mrb[3].mxu0  ;;  %v366_v51 = vsel %vm365_vm2, %v359_v46, 0.0 }
 0x283   : > { %367 = vadd.xlane.f32.xlu0 %v366_v51 }
 0x284   : > { %v369_v52 = vsel %vm365_vm2, %v362_v49, 0.0 }
 0x285   : > { %370 = vadd.xlane.f32.xlu1 %v369_v52 }
 0x310   : > { %v368_v53 = vpop.xlane.xlu0 %367 }
 0x311   : > { %v373_v54 = vmul.f32 0.03125, %v368_v53 }
 0x312   : > { %v371_v55 = vpop.xlane.xlu1 %370 }
 0x313   : > { %v375_v56 = vsub.f32 %v359_v46, %v373_v54  ;;  %v374_v57 = vmul.f32 0.03125, %v371_v55 }
 0x315   : > { %v376_v58 = vsub.f32 %v362_v49, %v374_v57  ;;  %v377_v59 = vmul.f32 %v375_v56, %v375_v56 }
 0x317   : > { %v379_v60 = vsel %vm365_vm2, %v377_v59, 0.0  ;;  %v378_v61 = vmul.f32 %v376_v58, %v376_v58 }
 0x318   : > { %380 = vadd.xlane.f32.xlu0 %v379_v60 }
 0x319   : > { %v382_v62 = vsel %vm365_vm2, %v378_v61, 0.0 }
 0x31a   : > { %383 = vadd.xlane.f32.xlu1 %v382_v62  ;;  %v2116_v62 = vsub.s32 7, %v2051_v25 }
 0x31c   : > { %v571_v2 = vrot.slane %v2056_v28, %v2116_v62 }
 0x3a5   : > { %v381_v3 = vpop.xlane.xlu0 %380 }
 0x3a6   : > { %v385_v4 = vmul.f32 0.03125, %v381_v3 }
 0x3a7   : > { %v384_v5 = vpop.xlane.xlu1 %383 }
 0x3a8   : > { %v387_v6 = vadd.f32 1e-06, %v385_v4  ;;  %v386_v7 = vmul.f32 0.03125, %v384_v5  ;;  %v577_v5 = vrot.slane %v2118_v63, %v2054_v27 }
 0x3aa   : > { %1615 = vrsqrt.f32 %v387_v6  ;;  %v388_v8 = vadd.f32 1e-06, %v386_v7 }
 0x3ac   : > { %1617 = vrsqrt.f32 %v388_v8 }
 0x3b4   : > { %v1616_v12 = vpop.eup %1615 }
 0x3b5   : > { %v391_v13 = vmul.f32 %v1616_v12, %v375_v56 }
 0x3b6   : > { %v1618_v16 = vpop.eup %1617 }
 0x3b7   : > { %v392_v17 = vmul.f32 %v1618_v16, %v376_v58  ;;  %v397_v18 = vmul.f32 %v396_v11, %v391_v13 }
 0x3b9   : > { %v398_v19 = vmul.f32 %v396_v11, %v392_v17  ;;  %v403_v20 = vadd.f32 %v402_v14, %v397_v18 }
 0x3bb   : > { %v404_v21 = vadd.f32 %v402_v14, %v398_v19  ;;  %v405_v22 = vmax.f32 %v403_v20, 0.0 }
 0x3bd   : > { %v406_v23 = vmax.f32 %v404_v21, 0.0 }
 0x3bf   : > { %v407_v26 = vpack.c.bf16 %v406_v23, %v405_v22 }
 0x3c1   : > { %1427 = vmatmul.mubr.msk.bf16.vlgmr.msra.gmra.mrb[0].mxu1 %vm365_vm2, %v407_v26 }
 0x3c2   : > { %1431 = vmatpush3.bf16.msra.mxu1 %v1595_v24  ;;  %1438 = vmatprep.mubr.msk.bf16.mxu1 %vm1813_vm1, %v1812_v15 }
 0x3c3   : > { %1432 = vmatprep.subr.bf16.mxu1 %v1812_v15 }
 0x3c6   : > { %1433 = vmatpush3.bf16.msra.mxu1 %v1596_v29 }
 0x3c7   : > { %1434 = vmatprep.subr.bf16.mxu1 %v1812_v15 }
 0x3ca   : > { %1435 = vmatpush3.bf16.msra.mxu1 %v1597_v31  ;;  %v1599_v31 = vld [vmem:[#allocation7 + $0x60] sm:$0xff]  }
 0x3cb   : > { %1436 = vmatprep.subr.bf16.mxu1 %v1812_v15  ;;  %1443 = vmatpush3.bf16.msra.mxu0 %v1599_v31 }
 0x3cc   : > { %1444 = vmatprep.subr.bf16.mxu0 %v1812_v15 }
 0x3ce   : > { %1437 = vmatpush3.bf16.msra.mxu1 %v1598_v32  ;;  %v1600_v32 = vld [vmem:[#allocation7 + $0x68] sm:$0xff]  }
 0x3cf   : > { %1466 = vmatprep.subr.bf16.mxu1 %v1812_v15  ;;  %1445 = vmatpush3.bf16.msra.mxu0 %v1600_v32 }
 0x3d0   : > { %1450 = vmatprep.subr.bf16.mxu0 %v1812_v15 }
 0x3d1   : > { %1439 = vmatmul.mubr.msk.bf16.vlgmr.msra.gmra.mrb[0].mxu1 %vm250_vm0, %v249_v33 }
 0x3d2   : > { %1470 = vmatprep.mubr.msk.bf16.mxu1 %vm1813_vm1, %v1812_v15 }
 0x4a4   : > { %v533_v37 = vpop.f32.mrb[0].mxu1 }
 0x4a5   : > { %v1491_v38 = vadd.f32 %v1490_v1, %v533_v37  ;;  %v1440_v39 = vpop.f32.mrb[1].mxu1 }
 0x4a6   : > { %v536_v40 = vpop.f32.mrb[2].mxu1  ;;  %v627_v39 = vrot.slane %v2118_v63, %v2061_v30 }
 0x4a7   : > { %v1493_v41 = vadd.f32 %v1490_v1, %v536_v40  ;;  %v1441_v42 = vpop.f32.mrb[3].mxu1  ;;  %v542_v44 = vsel %vm365_vm2, %v1491_v38, 0.0 }
 0x4a8   : > { %543 = vadd.xlane.f32.xlu0 %v542_v44  ;;  %v633_v42 = vrot.slane %v2118_v63, %v2069_v43 }
 0x4a9   : > { %v545_v45 = vsel %vm365_vm2, %v1493_v41, 0.0 }
 0x4aa   : > { %546 = vadd.xlane.f32.xlu1 %v545_v45 }
 0x535   : > { %v544_v46 = vpop.xlane.xlu0 %543 }
 0x536   : > { %v548_v47 = vmul.f32 0.03125, %v544_v46 }
 0x537   : > { %v547_v48 = vpop.xlane.xlu1 %546 }
 0x538   : > { %v550_v49 = vsub.f32 %v1491_v38, %v548_v47  ;;  %v549_v50 = vmul.f32 0.03125, %v547_v48 }
 0x53a   : > { %v551_v51 = vsub.f32 %v1493_v41, %v549_v50  ;;  %v552_v52 = vmul.f32 %v550_v49, %v550_v49 }
 0x53c   : > { %v554_v53 = vsel %vm365_vm2, %v552_v52, 0.0  ;;  %v553_v54 = vmul.f32 %v551_v51, %v551_v51 }
 0x53d   : > { %555 = vadd.xlane.f32.xlu0 %v554_v53  ;;  %v642_v53 = vrot.slane %v2118_v63, %v2080_v9 }
 0x53e   : > { %v557_v55 = vsel %vm365_vm2, %v553_v54, 0.0 }
 0x53f   : > { %558 = vadd.xlane.f32.xlu1 %v557_v55 }
 0x5ca   : > { %v556_v56 = vpop.xlane.xlu0 %555 }
 0x5cb   : > { %v560_v57 = vmul.f32 0.03125, %v556_v56 }
 0x5cc   : > { %v559_v58 = vpop.xlane.xlu1 %558 }
 0x5cd   : > { %v562_v59 = vadd.f32 1e-06, %v560_v57  ;;  %v561_v60 = vmul.f32 0.03125, %v559_v58 }
 0x5cf   : > { %1619 = vrsqrt.f32 %v562_v59  ;;  %v563_v61 = vadd.f32 1e-06, %v561_v60 }
 0x5d1   : > { %1621 = vrsqrt.f32 %v563_v61 }
 0x5d9   : > { %v1620_v3 = vpop.eup %1619 }
 0x5da   : > { %v566_v4 = vmul.f32 %v1620_v3, %v550_v49 }
 0x5db   : > { %v1622_v6 = vpop.eup %1621 }
 0x5dc   : > { %v572_v7 = vmul.f32 %v571_v2, %v566_v4  ;;  %v567_v8 = vmul.f32 %v1622_v6, %v551_v51 }
 0x5de   : > { %v578_v11 = vadd.f32 %v577_v5, %v572_v7  ;;  %v573_v12 = vmul.f32 %v571_v2, %v567_v8 }
 0x5e0   : > { %v2124_v13 = vmax.f32 %v578_v11, 0.0  ;;  %v579_v14 = vadd.f32 %v577_v5, %v573_v12 }
 0x5e2   : > { %v598_v25 = vsel %vm365_vm2, %v2124_v13, 0.0  ;;  %v2128_v16 = vmax.f32 %v579_v14, 0.0 }
 0x5e3   : > { %599 = vadd.xlane.f32.xlu0 %v598_v25  ;;  %v1601_v25 = vld [vmem:[#allocation7 + $0x80] sm:$0xff]  }
 0x5e4   : > { %v601_v28 = vsel %vm365_vm2, %v2128_v16, 0.0 }
 0x5e5   : > { %602 = vadd.xlane.f32.xlu1 %v601_v28  ;;  %v1602_v28 = vld [vmem:[#allocation7 + $0x88] sm:$0xff]  }
 0x670   : > { %v600_v17 = vpop.xlane.xlu0 %599 }
 0x671   : > { %v604_v18 = vmul.f32 0.03125, %v600_v17 }
 0x672   : > { %v603_v19 = vpop.xlane.xlu1 %602 }
 0x673   : > { %v606_v20 = vsub.f32 %v2124_v13, %v604_v18  ;;  %v605_v21 = vmul.f32 0.03125, %v603_v19 }
 0x675   : > { %v607_v22 = vsub.f32 %v2128_v16, %v605_v21  ;;  %v608_v23 = vmul.f32 %v606_v20, %v606_v20 }
 0x677   : > { %v610_v24 = vsel %vm365_vm2, %v608_v23, 0.0  ;;  %v609_v26 = vmul.f32 %v607_v22, %v607_v22  ;;  %v728_v23 = vrot.slane %v2118_v63, %v2083_v10 }
 0x678   : > { %611 = vadd.xlane.f32.xlu0 %v610_v24 }
 0x679   : > { %v613_v29 = vsel %vm365_vm2, %v609_v26, 0.0  ;;  %v734_v26 = vrot.slane %v2118_v63, %v2102_v34 }
 0x67a   : > { %614 = vadd.xlane.f32.xlu1 %v613_v29 }
 0x705   : > { %v612_v33 = vpop.xlane.xlu0 %611 }
 0x706   : > { %v616_v36 = vmul.f32 0.03125, %v612_v33 }
 0x707   : > { %v615_v0 = vpop.xlane.xlu1 %614 }
 0x708   : > { %v618_v1 = vadd.f32 1e-06, %v616_v36  ;;  %v617_v37 = vmul.f32 0.03125, %v615_v0 }
 0x70a   : > { %1623 = vrsqrt.f32 %v618_v1  ;;  %v619_v38 = vadd.f32 1e-06, %v617_v37 }
 0x70c   : > { %1625 = vrsqrt.f32 %v619_v38 }
 0x714   : > { %v1624_v40 = vpop.eup %1623 }
 0x715   : > { %v622_v41 = vmul.f32 %v1624_v40, %v606_v20 }
 0x716   : > { %v1626_v44 = vpop.eup %1625 }
 0x717   : > { %v628_v45 = vmul.f32 %v627_v39, %v622_v41  ;;  %v623_v46 = vmul.f32 %v1626_v44, %v607_v22  ;;  %v1604_v41 = vld [vmem:[#allocation7 + $0xa8] sm:$0xff]   ;;  %v743_v44 = vrot.slane %v2118_v63, %v2105_v35 }
 0x719   : > { %v629_v47 = vmul.f32 %v627_v39, %v623_v46  ;;  %v634_v48 = vadd.f32 %v633_v42, %v628_v45  ;;  %v1603_v39 = vld [vmem:[#allocation7 + $0xa0] sm:$0xff]   ;;  %v803_v45 = vrot.slane %v2118_v63, %v2116_v62 }
 0x71b   : > { %v635_v49 = vadd.f32 %v633_v42, %v629_v47  ;;  %v636_v50 = vmax.f32 %v634_v48, 0.0  ;;  %v597_v42 = vpack.c.bf16 %v2128_v16, %v2124_v13  ;;  %v1494_v46 = vadd.f32 %v803_v45, %v743_v44 }
 0x71d   : > { %v637_v51 = vmax.f32 %v635_v49, 0.0 }
 0x71f   : > { %v638_v52 = vpack.c.bf16 %v637_v51, %v636_v50 }
 0x721   : > { %1447 = vmatmul.mubr.msk.bf16.vlgmr.msra.gmra.mrb[4].mxu0 %vm365_vm2, %v638_v52 }
 0x722   : > { %1454 = vmatprep.mubr.msk.bf16.mxu0 %vm1813_vm1, %v1812_v15  ;;  %1451 = vmatpush3.bf16.msra.mxu0 %v1601_v25 }
 0x723   : > { %1452 = vmatprep.subr.bf16.mxu0 %v1812_v15 }
 0x726   : > { %1453 = vmatpush3.bf16.msra.mxu0 %v1602_v28 }
 0x727   : > { %1458 = vmatprep.subr.bf16.mxu0 %v1812_v15 }
 0x7f4   : > { %v692_v54 = vpop.f32.mrb[4].mxu0 }
 0x7f5   : > { %v693_v55 = vadd.f32 %v692_v54, %v642_v53  ;;  %v1448_v56 = vpop.f32.mrb[5].mxu0 }
 0x7f6   : > { %v695_v57 = vpop.f32.mrb[6].mxu0 }
 0x7f7   : > { %v696_v58 = vadd.f32 %v695_v57, %v642_v53  ;;  %v1449_v59 = vpop.f32.mrb[7].mxu0  ;;  %v699_v60 = vsel %vm365_vm2, %v693_v55, 0.0 }
 0x7f8   : > { %700 = vadd.xlane.f32.xlu0 %v699_v60 }
 0x7f9   : > { %v702_v61 = vsel %vm365_vm2, %v696_v58, 0.0 }
 0x7fa   : > { %703 = vadd.xlane.f32.xlu1 %v702_v61 }
 0x885   : > { %v701_v2 = vpop.xlane.xlu0 %700 }
 0x886   : > { %v705_v3 = vmul.f32 0.03125, %v701_v2 }
 0x887   : > { %v704_v4 = vpop.xlane.xlu1 %703 }
 0x888   : > { %v707_v5 = vsub.f32 %v693_v55, %v705_v3  ;;  %v706_v6 = vmul.f32 0.03125, %v704_v4 }
 0x88a   : > { %v708_v7 = vsub.f32 %v696_v58, %v706_v6  ;;  %v709_v8 = vmul.f32 %v707_v5, %v707_v5 }
 0x88c   : > { %v711_v11 = vsel %vm365_vm2, %v709_v8, 0.0  ;;  %v710_v12 = vmul.f32 %v708_v7, %v708_v7  ;;  %v2172_v8 = vld [vmem:[#allocation5 + $0x10] sm:$0xff] }
 0x88d   : > { %712 = vadd.xlane.f32.xlu0 %v711_v11  ;;  %v891_v11 = vrot.slane %v2172_v8, %v2054_v27  ;;  %v897_v25 = vrot.slane %v2172_v8, %v2061_v30 }
 0x88e   : > { %v714_v14 = vsel %vm365_vm2, %v710_v12, 0.0 }
 0x88f   : > { %715 = vadd.xlane.f32.xlu1 %v714_v14 }
 0x91a   : > { %v713_v17 = vpop.xlane.xlu0 %712 }
 0x91b   : > { %v717_v18 = vmul.f32 0.03125, %v713_v17 }
 0x91c   : > { %v716_v19 = vpop.xlane.xlu1 %715 }
 0x91d   : > { %v719_v20 = vadd.f32 1e-06, %v717_v18  ;;  %v718_v21 = vmul.f32 0.03125, %v716_v19 }
 0x91f   : > { %1627 = vrsqrt.f32 %v719_v20  ;;  %v720_v22 = vadd.f32 1e-06, %v718_v21 }
 0x921   : > { %1629 = vrsqrt.f32 %v720_v22 }
 0x929   : > { %v1628_v24 = vpop.eup %1627 }
 0x92a   : > { %v723_v29 = vmul.f32 %v1628_v24, %v707_v5 }
 0x92b   : > { %v1630_v31 = vpop.eup %1629 }
 0x92c   : > { %v729_v32 = vmul.f32 %v728_v23, %v723_v29  ;;  %v724_v33 = vmul.f32 %v1630_v31, %v708_v7 }
 0x92e   : > { %v730_v36 = vmul.f32 %v728_v23, %v724_v33  ;;  %v735_v0 = vadd.f32 %v734_v26, %v729_v32 }
 0x930   : > { %v736_v1 = vadd.f32 %v734_v26, %v730_v36  ;;  %v737_v37 = vmax.f32 %v735_v0, 0.0 }
 0x932   : > { %v738_v38 = vmax.f32 %v736_v1, 0.0 }
 0x934   : > { %v739_v40 = vpack.c.bf16 %v738_v38, %v737_v37 }
 0x936   : > { %1455 = vmatmul.mubr.msk.bf16.vlgmr.msra.gmra.mrb[8].mxu0 %vm365_vm2, %v739_v40  ;;  %v1605_v40 = vld [vmem:[#allocation7 + $0xc0] sm:$0xff]  }
 0x937   : > { %1459 = vmatpush3.bf16.msra.mxu0 %v1603_v39  ;;  %1462 = vmatprep.mubr.msk.bf16.mxu0 %vm1813_vm1, %v1812_v15 }
 0x938   : > { %1460 = vmatprep.subr.bf16.mxu0 %v1812_v15  ;;  %1467 = vmatpush3.bf16.msra.mxu1 %v1605_v40 }
 0x939   : > { %1468 = vmatprep.subr.bf16.mxu1 %v1812_v15 }
 0x93b   : > { %1461 = vmatpush3.bf16.msra.mxu0 %v1604_v41  ;;  %v1606_v41 = vld [vmem:[#allocation7 + $0xc8] sm:$0xff]  }
 0x93c   : > { %1469 = vmatpush3.bf16.msra.mxu1 %v1606_v41 }
 0x93d   : > { %1474 = vmatprep.subr.bf16.mxu1 %v1812_v15 }
 0x942   : > { %1463 = vmatmul.mubr.msk.bf16.vlgmr.msra.gmra.mrb[8].mxu0 %vm365_vm2, %v597_v42 }
 0xa15   : > { %v853_v47 = vpop.f32.mrb[8].mxu0 }
 0xa16   : > { %v1495_v48 = vadd.f32 %v1494_v46, %v853_v47  ;;  %v1464_v49 = vpop.f32.mrb[9].mxu0 }
 0xa17   : > { %v856_v50 = vpop.f32.mrb[10].mxu0  ;;  %v947_v49 = vrot.slane %v2172_v8, %v2069_v43 }
 0xa18   : > { %v1497_v51 = vadd.f32 %v1494_v46, %v856_v50  ;;  %v1465_v52 = vpop.f32.mrb[11].mxu0  ;;  %v862_v53 = vsel %vm365_vm2, %v1495_v48, 0.0 }
 0xa19   : > { %863 = vadd.xlane.f32.xlu0 %v862_v53  ;;  %v953_v52 = vrot.slane %v2172_v8, %v2080_v9 }
 0xa1a   : > { %v865_v13 = vsel %vm365_vm2, %v1497_v51, 0.0 }
 0xa1b   : > { %866 = vadd.xlane.f32.xlu1 %v865_v13 }
 0xaa6   : > { %v864_v16 = vpop.xlane.xlu0 %863 }
 0xaa7   : > { %v868_v54 = vmul.f32 0.03125, %v864_v16 }
 0xaa8   : > { %v867_v55 = vpop.xlane.xlu1 %866 }
 0xaa9   : > { %v870_v56 = vsub.f32 %v1495_v48, %v868_v54  ;;  %v869_v57 = vmul.f32 0.03125, %v867_v55 }
 0xaab   : > { %v871_v58 = vsub.f32 %v1497_v51, %v869_v57  ;;  %v872_v63 = vmul.f32 %v870_v56, %v870_v56 }
 0xaad   : > { %v874_v59 = vsel %vm365_vm2, %v872_v63, 0.0  ;;  %v873_v60 = vmul.f32 %v871_v58, %v871_v58 }
 0xaae   : > { %875 = vadd.xlane.f32.xlu0 %v874_v59  ;;  %v962_v59 = vrot.slane %v2172_v8, %v2083_v10 }
 0xaaf   : > { %v877_v61 = vsel %vm365_vm2, %v873_v60, 0.0 }
 0xab0   : > { %878 = vadd.xlane.f32.xlu1 %v877_v61 }
 0xb3b   : > { %v876_v2 = vpop.xlane.xlu0 %875 }
 0xb3c   : > { %v880_v3 = vmul.f32 0.03125, %v876_v2 }
 0xb3d   : > { %v879_v4 = vpop.xlane.xlu1 %878 }
 0xb3e   : > { %v882_v5 = vadd.f32 1e-06, %v880_v3  ;;  %v881_v6 = vmul.f32 0.03125, %v879_v4 }
 0xb40   : > { %1631 = vrsqrt.f32 %v882_v5  ;;  %v883_v7 = vadd.f32 1e-06, %v881_v6 }
 0xb42   : > { %1633 = vrsqrt.f32 %v883_v7 }
 0xb4a   : > { %v1632_v12 = vpop.eup %1631 }
 0xb4b   : > { %v886_v14 = vmul.f32 %v1632_v12, %v870_v56 }
 0xb4c   : > { %v1634_v28 = vpop.eup %1633 }
 0xb4d   : > { %v892_v17 = vmul.f32 %v891_v11, %v886_v14  ;;  %v887_v18 = vmul.f32 %v1634_v28, %v871_v58 }
 0xb4f   : > { %v898_v19 = vadd.f32 %v897_v25, %v892_v17  ;;  %v893_v20 = vmul.f32 %v891_v11, %v887_v18 }
 0xb51   : > { %v2178_v21 = vmax.f32 %v898_v19, 0.0  ;;  %v899_v22 = vadd.f32 %v897_v25, %v893_v20  ;;  %v1607_v20 = vld [vmem:[#allocation7 + $0xe0] sm:$0xff]  }
 0xb53   : > { %v918_v23 = vsel %vm365_vm2, %v2178_v21, 0.0  ;;  %v2182_v24 = vmax.f32 %v899_v22, 0.0  ;;  %v1608_v22 = vld [vmem:[#allocation7 + $0xe8] sm:$0xff]  }
 0xb54   : > { %919 = vadd.xlane.f32.xlu0 %v918_v23 }
 0xb55   : > { %v921_v26 = vsel %vm365_vm2, %v2182_v24, 0.0 }
 0xb56   : > { %922 = vadd.xlane.f32.xlu1 %v921_v26 }
 0xbe1   : > { %v920_v29 = vpop.xlane.xlu0 %919 }
 0xbe2   : > { %v924_v31 = vmul.f32 0.03125, %v920_v29 }
 0xbe3   : > { %v923_v32 = vpop.xlane.xlu1 %922 }
 0xbe4   : > { %v926_v33 = vsub.f32 %v2178_v21, %v924_v31  ;;  %v925_v36 = vmul.f32 0.03125, %v923_v32 }
 0xbe6   : > { %v927_v0 = vsub.f32 %v2182_v24, %v925_v36  ;;  %v928_v1 = vmul.f32 %v926_v33, %v926_v33  ;;  %v1048_v36 = vrot.slane %v2172_v8, %v2102_v34  ;;  %v917_v34 = vpack.c.bf16 %v2182_v24, %v2178_v21 }
 0xbe8   : > { %v930_v37 = vsel %vm365_vm2, %v928_v1, 0.0  ;;  %v929_v38 = vmul.f32 %v927_v0, %v927_v0  ;;  %v1054_v1 = vrot.slane %v2172_v8, %v2105_v35  ;;  %v226_v35 = vld [vmem:[#allocation5 + $0x18] sm:$0x7] }
 0xbe9   : > { %931 = vadd.xlane.f32.xlu0 %v930_v37 }
 0xbea   : > { %v933_v39 = vsel %vm365_vm2, %v929_v38, 0.0 }
 0xbeb   : > { %934 = vadd.xlane.f32.xlu1 %v933_v39 }
 0xc76   : > { %v932_v42 = vpop.xlane.xlu0 %931 }
 0xc77   : > { %v936_v44 = vmul.f32 0.03125, %v932_v42 }
 0xc78   : > { %v935_v45 = vpop.xlane.xlu1 %934 }
 0xc79   : > { %v938_v46 = vadd.f32 1e-06, %v936_v44  ;;  %v937_v47 = vmul.f32 0.03125, %v935_v45 }
 0xc7b   : > { %1635 = vrsqrt.f32 %v938_v46  ;;  %v939_v48 = vadd.f32 1e-06, %v937_v47  ;;  %v1609_v47 = vld [vmem:[#allocation7 + $0x100] sm:$0xff]  }
 0xc7d   : > { %1637 = vrsqrt.f32 %v939_v48 }
 0xc85   : > { %v1636_v50 = vpop.eup %1635 }
 0xc86   : > { %v942_v51 = vmul.f32 %v1636_v50, %v926_v33  ;;  %v1063_v50 = vrot.slane %v2172_v8, %v2116_v62 }
 0xc87   : > { %v1638_v53 = vpop.eup %1637 }
 0xc88   : > { %v948_v13 = vmul.f32 %v947_v49, %v942_v51  ;;  %v943_v16 = vmul.f32 %v1638_v53, %v927_v0  ;;  %v1123_v51 = vrot.slane %v226_v35, %v2054_v27 }
 0xc8a   : > { %v949_v54 = vmul.f32 %v947_v49, %v943_v16  ;;  %v954_v55 = vadd.f32 %v953_v52, %v948_v13  ;;  %v1610_v49 = vld [vmem:[#allocation7 + $0x108] sm:$0xff]  }
 0xc8c   : > { %v955_v56 = vadd.f32 %v953_v52, %v949_v54  ;;  %v956_v57 = vmax.f32 %v954_v55, 0.0  ;;  %v1498_v52 = vadd.f32 %v1123_v51, %v1063_v50 }
 0xc8e   : > { %v957_v58 = vmax.f32 %v955_v56, 0.0 }
 0xc90   : > { %v958_v63 = vpack.c.bf16 %v957_v58, %v956_v57 }
 0xc92   : > { %1471 = vmatmul.mubr.msk.bf16.vlgmr.msra.gmra.mrb[4].mxu1 %vm365_vm2, %v958_v63 }
 0xc93   : > { %1478 = vmatprep.mubr.msk.bf16.mxu1 %vm1813_vm1, %v1812_v15  ;;  %1475 = vmatpush3.bf16.msra.mxu1 %v1607_v20 }
 0xc94   : > { %1476 = vmatprep.subr.bf16.mxu1 %v1812_v15 }
 0xc97   : > { %1477 = vmatpush3.bf16.msra.mxu1 %v1608_v22 }
 0xc98   : > { %1482 = vmatprep.subr.bf16.mxu1 %v1812_v15 }
 0xd65   : > { %v1012_v60 = vpop.f32.mrb[4].mxu1 }
 0xd66   : > { %v1013_v61 = vadd.f32 %v1012_v60, %v962_v59  ;;  %v1472_v9 = vpop.f32.mrb[5].mxu1 }
 0xd67   : > { %v1015_v2 = vpop.f32.mrb[6].mxu1 }
 0xd68   : > { %v1016_v3 = vadd.f32 %v1015_v2, %v962_v59  ;;  %v1473_v4 = vpop.f32.mrb[7].mxu1  ;;  %v1019_v5 = vsel %vm365_vm2, %v1013_v61, 0.0 }
 0xd69   : > { %1020 = vadd.xlane.f32.xlu0 %v1019_v5 }
 0xd6a   : > { %v1022_v6 = vsel %vm365_vm2, %v1016_v3, 0.0 }
 0xd6b   : > { %1023 = vadd.xlane.f32.xlu1 %v1022_v6 }
 0xdf6   : > { %v1021_v7 = vpop.xlane.xlu0 %1020 }
 0xdf7   : > { %v1025_v11 = vmul.f32 0.03125, %v1021_v7  ;;  %v1211_v7 = vrot.slane %v226_v35, %v2061_v30 }
 0xdf8   : > { %v1024_v12 = vpop.xlane.xlu1 %1023 }
 0xdf9   : > { %v1027_v14 = vsub.f32 %v1013_v61, %v1025_v11  ;;  %v1026_v25 = vmul.f32 0.03125, %v1024_v12  ;;  %v1217_v12 = vrot.slane %v226_v35, %v2069_v43 }
 0xdfb   : > { %v1028_v28 = vsub.f32 %v1016_v3, %v1026_v25  ;;  %v1029_v17 = vmul.f32 %v1027_v14, %v1027_v14 }
 0xdfd   : > { %v1031_v10 = vsel %vm365_vm2, %v1029_v17, 0.0  ;;  %v1030_v18 = vmul.f32 %v1028_v28, %v1028_v28 }
 0xdfe   : > { %1032 = vadd.xlane.f32.xlu0 %v1031_v10 }
 0xdff   : > { %v1034_v19 = vsel %vm365_vm2, %v1030_v18, 0.0 }
 0xe00   : > { %1035 = vadd.xlane.f32.xlu1 %v1034_v19 }
 0xe8b   : > { %v1033_v23 = vpop.xlane.xlu0 %1032 }
 0xe8c   : > { %v1037_v26 = vmul.f32 0.03125, %v1033_v23 }
 0xe8d   : > { %v1036_v29 = vpop.xlane.xlu1 %1035 }
 0xe8e   : > { %v1039_v31 = vadd.f32 1e-06, %v1037_v26  ;;  %v1038_v32 = vmul.f32 0.03125, %v1036_v29 }
 0xe90   : > { %1639 = vrsqrt.f32 %v1039_v31  ;;  %v1040_v33 = vadd.f32 1e-06, %v1038_v32 }
 0xe92   : > { %1641 = vrsqrt.f32 %v1040_v33 }
 0xe9a   : > { %v1640_v0 = vpop.eup %1639 }
 0xe9b   : > { %v1043_v37 = vmul.f32 %v1640_v0, %v1027_v14 }
 0xe9c   : > { %v1642_v38 = vpop.eup %1641 }
 0xe9d   : > { %v1049_v39 = vmul.f32 %v1048_v36, %v1043_v37  ;;  %v1044_v40 = vmul.f32 %v1642_v38, %v1028_v28 }
 0xe9f   : > { %v1050_v41 = vmul.f32 %v1048_v36, %v1044_v40  ;;  %v1055_v42 = vadd.f32 %v1054_v1, %v1049_v39 }
 0xea1   : > { %v1056_v44 = vadd.f32 %v1054_v1, %v1050_v41  ;;  %v1057_v45 = vmax.f32 %v1055_v42, 0.0 }
 0xea3   : > { %v1058_v46 = vmax.f32 %v1056_v44, 0.0 }
 0xea5   : > { %v1059_v48 = vpack.c.bf16 %v1058_v46, %v1057_v45 }
 0xea7   : > { %1479 = vmatmul.mubr.msk.bf16.vlgmr.msra.gmra.mrb[8].mxu1 %vm365_vm2, %v1059_v48 }
 0xea8   : > { %1483 = vmatpush3.bf16.msra.mxu1 %v1609_v47  ;;  %1486 = vmatprep.mubr.msk.bf16.mxu1 %vm1813_vm1, %v1812_v15 }
 0xea9   : > { %1484 = vmatprep.subr.bf16.mxu1 %v1812_v15 }
 0xeac   : > { %1485 = vmatpush3.bf16.msra.mxu1 %v1610_v49 }
 0xeb3   : > { %1487 = vmatmul.mubr.msk.bf16.vlgmr.msra.gmra.mrb[8].mxu1 %vm365_vm2, %v917_v34 }
 0xf86   : > { %v1173_v53 = vpop.f32.mrb[8].mxu1 }
 0xf87   : > { %v1499_v13 = vadd.f32 %v1498_v52, %v1173_v53  ;;  %v1488_v16 = vpop.f32.mrb[9].mxu1 }
 0xf88   : > { %v1176_v54 = vpop.f32.mrb[10].mxu1 }
 0xf89   : > { %v1501_v55 = vadd.f32 %v1498_v52, %v1176_v54  ;;  %v1489_v56 = vpop.f32.mrb[11].mxu1  ;;  %v1182_v15 = vsel %vm365_vm2, %v1499_v13, 0.0 }
 0xf8a   : > { %1183 = vadd.xlane.f32.xlu0 %v1182_v15 }
 0xf8b   : > { %v1185_v21 = vsel %vm365_vm2, %v1501_v55, 0.0 }
 0xf8c   : > { %1186 = vadd.xlane.f32.xlu1 %v1185_v21 }
0x1017   : > { %v1184_v24 = vpop.xlane.xlu0 %1183 }
0x1018   : > { %v1188_v57 = vmul.f32 0.03125, %v1184_v24 }
0x1019   : > { %v1187_v58 = vpop.xlane.xlu1 %1186 }
0x101a   : > { %v1190_v63 = vsub.f32 %v1499_v13, %v1188_v57  ;;  %v1189_v62 = vmul.f32 0.03125, %v1187_v58 }
0x101c   : > { %v1191_v8 = vsub.f32 %v1501_v55, %v1189_v62  ;;  %v1192_v27 = vmul.f32 %v1190_v63, %v1190_v63 }
0x101e   : > { %v1194_v59 = vsel %vm365_vm2, %v1192_v27, 0.0  ;;  %v1193_v60 = vmul.f32 %v1191_v8, %v1191_v8 }
0x101f   : > { %1195 = vadd.xlane.f32.xlu0 %v1194_v59 }
0x1020   : > { %v1197_v61 = vsel %vm365_vm2, %v1193_v60, 0.0 }
0x1021   : > { %1198 = vadd.xlane.f32.xlu1 %v1197_v61 }
0x10ac   : > { %v1196_v9 = vpop.xlane.xlu0 %1195 }
0x10ad   : > { %v1200_v2 = vmul.f32 0.03125, %v1196_v9 }
0x10ae   : > { %v1199_v3 = vpop.xlane.xlu1 %1198 }
0x10af   : > { %v1202_v4 = vadd.f32 1e-06, %v1200_v2  ;;  %v1201_v5 = vmul.f32 0.03125, %v1199_v3 }
0x10b1   : > { %1643 = vrsqrt.f32 %v1202_v4  ;;  %v1203_v6 = vadd.f32 1e-06, %v1201_v5 }
0x10b3   : > { %1645 = vrsqrt.f32 %v1203_v6 }
0x10bb   : > { %v1644_v11 = vpop.eup %1643 }
0x10bc   : > { %v1206_v14 = vmul.f32 %v1644_v11, %v1190_v63 }
0x10bd   : > { %v1646_v25 = vpop.eup %1645 }
0x10be   : > { %v1212_v28 = vmul.f32 %v1211_v7, %v1206_v14  ;;  %v1207_v17 = vmul.f32 %v1646_v25, %v1191_v8 }
0x10c0   : > { %v1218_v10 = vadd.f32 %v1217_v12, %v1212_v28  ;;  %v1213_v18 = vmul.f32 %v1211_v7, %v1207_v17 }
0x10c2   : > { %v1219_v30 = vadd.f32 %v1217_v12, %v1213_v18  ;;  %1220 = vst.msk [vmem:[%s217_s20] sm:$0xff] %vm365_vm2, %v1218_v10 }
0x10c4   : > { %1221 = vst.msk [vmem:[%s217_s20 + $0x8] sm:$0xff] %vm365_vm2, %v1219_v30 }
0x10c5   : > { %1746 = shalt.err (!%p1743_p1)
}
0x10c6   : > { %s1747_s23 = scalar_lea.hbm %s2233_s22, 256  ;;  %s1751_s28 = scalar_lea.hbm %s2284_s3, 512 }
0x10c7   : > { %p1748_p13 = scmp.ne.s32.totalorder %s2233_s22, %s1747_s23  ;;  %p1752_p4 = scmp.lt.u32.totalorder %s2233_s22, %s2284_s3 }
0x10c8   : > { %p1753_p7 = scmp.lt.u32.totalorder %s1751_s28, %s1747_s23  ;;  %p1755_p11 = scmp.lt.u32.totalorder %s1747_s23, %s2233_s22 }
0x10c9   : > { %p1749_p6 = pnand %p1748_p13, %p2298_p0 }
0x10ca   : > { %p1754_p8 = por %p1753_p7, %p1752_p4 }
0x10cb   : > { %p1750_p10 = pneg %p1749_p6 }
0x10cc   : > { %p1756_p2 = por %p1755_p11, %p1754_p8 }
0x10ce   : > { %p1757_p3 = pnand %p1756_p2, %p1750_p10 }
0x10d0   : > { %1760 = shalt.err (!%p1757_p3)
}
0x10d1   : > { %s1815_s29 = smov 128   ;;  %s1816_s18 = smov 8  }
0x10d2   : > { %1524 = dma.vmem_to_hbm [thread:$0]  (%p2298_p0), %s2235_s7, 256, %s2233_s22, %s1223_s16, %s1815_s29, %s1815_s29, %s1816_s18  }
0x10d3 PF: > { %s1251_s20 = sand.u32 1, %s1791_s12   ;;  %p2299_p5 = scmp.ne.s32.totalorder %s2289_s19, 0 }
0x10d4   : > { %p2300_p9 = scmp.ge.s32.totalorder %s1803_s15, 2  ;;  %s1252_s8 = scalar_lea.sflag [#allocation4], %s1251_s20 }
0x10d6   : > { %p1538_p12 = pnand %p2300_p9, %p2299_p5 }
0x10d8   : > { %1786 = dma.done.wait (!%p1538_p12), %s1252_s8, 256  }
0x10d9   : > { %1788 = vsyncadd (!%p1538_p12), %s1252_s8, 4294967040  ;;  %p17_p1 = scmp.ge.s32.totalorder %s1950_s6, 4   ;;  %s2301_s12 = smov %s1795_s13 }
0x10da   : > { %s2302_s13 = smov %s1799_s14  ;;  %s2303_s14 = smov %s1959_s11 }
0x10db   : > { %s2304_s15 = smov %s1950_s6  ;;  %19 = sbr.rel (!%p17_p1) target bundleno = 6 (0x6), region = 93 }
0x10e2   :  { %1257 = vsyncpa [#allocation3], 1 }
0x10e3   :  { %1259 = vsyncpa [#allocation3 + $0x1], 1 }
0x10e4   :  { %1260 = vsyncpa [#allocation6], 1 }
0x10e5   :  { %1261 = vsyncpa [#allocation4], 1 }
0x10e6   :  { %1263 = vsyncpa [#allocation4 + $0x1], 1 }

</bundles_post_ra>
